<compile_context>
chip_gen: v6e
topology: v6e:2x2x1
jax: 0.10.0
libtpu: 0.0.40
codegen_flags: <defaults>
</compile_context>

<pallas_src>
import functools

import jax
import jax.numpy as jnp
from jax.experimental import pallas as pl
from jax.experimental.pallas import tpu as pltpu

# ---- module hyper-parameters (small, consistent with the forward pass) ----
N_EMBD = 32
NUM_HEADS = 4
HEAD_DIM = N_EMBD // NUM_HEADS
BLOCK_SIZE = 8          # max sequence length (tril buffer size)
DROPOUT = 0.1           # eval mode -> no-op
LN_EPS = 1e-5           # PyTorch nn.LayerNorm default

B = 2                   # batch
T = 8                   # sequence length (== encoder length here)

NEG = -1e30             # finite "masked" additive value (no NaN hazard)


# ------------------------------ the kernel ----------------------------------
def decoder_layer_kernel(acts_ref, vecs_ref, w_ref, w2_ref, out_ref,
                         *, batch, seqlen):
    E = N_EMBD
    BT = batch * seqlen
    scale = float(N_EMBD) ** (-0.5)

    # ---- unpack the small-parameter slab (one DMA) ----
    vecs = vecs_ref[...]                              # (10 + batch, 4E)
    ln1_g, ln1_b = vecs[0:1, 0:E], vecs[1:2, 0:E]
    ln2_g, ln2_b = vecs[2:3, 0:E], vecs[3:4, 0:E]
    ln3_g, ln3_b = vecs[4:5, 0:E], vecs[5:6, 0:E]
    sa_bo, ca_bo, ffn_b2 = vecs[6:7, 0:E], vecs[7:8, 0:E], vecs[8:9, 0:E]
    ffn_b1 = vecs[9:10, 0:4 * E]
    pad = vecs[10:10 + batch, 0:seqlen]               # (B, T), 1 = keep

    # ---- activations (row-stacked y | enc, one DMA) ----
    y = acts_ref[0:BT, :]                             # (BT, E)
    enc = acts_ref[BT:2 * BT, :]                      # (BT, E)

    # ---- additive masks, built once per batch (0 keep / -1e30 masked) ----
    r = jax.lax.broadcasted_iota(jnp.int32, (seqlen, seqlen), 0)
    c = jax.lax.broadcasted_iota(jnp.int32, (seqlen, seqlen), 1)
    causal_add = jnp.where(c <= r, jnp.float32(0.0), jnp.float32(NEG))  # (T,T)
    pad_add = jnp.where(pad > 0.0, jnp.float32(0.0), jnp.float32(NEG))  # (B,T)
    sa_mask = causal_add[None, :, :] + pad_add[:, None, :]              # (B,T,T)
    ca_mask = pad_add[:, None, :]                                       # (B,1,T)

    def layernorm(x, g, b):
        # independent reductions (pipeline through the XLU), var = E[x^2]-mu^2
        mu = jnp.mean(x, axis=-1, keepdims=True)
        ms = jnp.mean(x * x, axis=-1, keepdims=True)
        var = ms - mu * mu
        return (x - mu) * jax.lax.rsqrt(var + LN_EPS) * g + b

    def softmax_rows(s):
        m = jnp.max(s, axis=-1, keepdims=True)
        e = jnp.exp(s - m)
        # approx reciprocal -> EUP slot, off the VPU critical path
        return e * pl.reciprocal(jnp.sum(e, axis=-1, keepdims=True), approx=True)

    def attention(q, k, v, add_mask, wo, bo):
        """q,k,v: (BT,E); add_mask: (B,*,T); returns multi-head attn @ wo + bo."""
        q3 = q.reshape(batch, seqlen, E)
        k3 = k.reshape(batch, seqlen, E)
        v3 = v.reshape(batch, seqlen, E)
        acc = None
        for h in range(NUM_HEADS):                    # static unroll, tiny H
            sl = slice(h * HEAD_DIM, (h + 1) * HEAD_DIM)
            # batched over B: single contraction per head (no per-batch loop)
            s = jnp.einsum('bqd,bkd->bqk', q3[:, :, sl], k3[:, :, sl],
                           preferred_element_type=jnp.float32) * scale + add_mask
            p = softmax_rows(s)                       # attn dropout: eval no-op
            o = jnp.einsum('bqk,bkd->bqd', p, v3[:, :, sl],
                           preferred_element_type=jnp.float32)
            # fold the output projection per head and accumulate -> no concat
            contrib = jnp.dot(o.reshape(BT, HEAD_DIM), wo[sl, :],
                              preferred_element_type=jnp.float32)
            acc = contrib if acc is None else acc + contrib
        return acc + bo

    # weight-slab column layout (in units of E columns):
    #   [0:3E)  sa_wq|sa_wk|sa_wv   [3E:4E) sa_wo
    #   [4E:7E) ca_wq|ca_wk|ca_wv   [7E:8E) ca_wo
    #   [8E:12E) ffn_w1

    # ---- masked causal self-attention sub-block ----
    h1 = layernorm(y, ln1_g, ln1_b)
    qkv = jnp.dot(h1, w_ref[:, 0:3 * E], preferred_element_type=jnp.float32)
    y = y + attention(qkv[:, 0:E], qkv[:, E:2 * E], qkv[:, 2 * E:3 * E],
                      sa_mask, w_ref[:, 3 * E:4 * E], sa_bo)

    # ---- cross-attention sub-block (K/V from encoder output, no causal) ----
    h2 = layernorm(y, ln2_g, ln2_b)
    # fuse Q and K/V projections into one MXU push: [h2; enc] @ [wq|wk|wv]
    stacked = jnp.concatenate([h2, enc], axis=0)                     # (2BT, E)
    proj = jnp.dot(stacked, w_ref[:, 4 * E:7 * E],
                   preferred_element_type=jnp.float32)               # (2BT, 3E)
    q = proj[0:BT, 0:E]
    k = proj[BT:2 * BT, E:2 * E]
    v = proj[BT:2 * BT, 2 * E:3 * E]
    y = y + attention(q, k, v, ca_mask, w_ref[:, 7 * E:8 * E], ca_bo)

    # ---- feed-forward sub-block ----
    h3 = layernorm(y, ln3_g, ln3_b)
    hid = jnp.maximum(
        jnp.dot(h3, w_ref[:, 8 * E:12 * E],
                preferred_element_type=jnp.float32) + ffn_b1, 0.0)
    y = y + jnp.dot(hid, w2_ref[...], preferred_element_type=jnp.float32) + ffn_b2
    # TODO(synk): Dropout layers are identity here (inference/eval semantics).

    out_ref[...] = y                                  # one dense slab store


# ------------------------------ wrapper --------------------------------------
def decoder_layer(y, encoder_out, pad_mask, params):
    """y, encoder_out: (B, T, N_EMBD) float32; pad_mask: (B, T) float32 (1=keep)."""
    Bv, Tv, Ev = y.shape
    BT = Bv * Tv
    E = Ev
    WV = 4 * E                                        # small-slab width
    assert Tv <= WV and E <= WV

    yf = y.reshape(BT, E).astype(jnp.float32)
    encf = encoder_out.reshape(BT, E).astype(jnp.float32)
    acts = jnp.concatenate([yf, encf], axis=0)        # (2BT, E): one input DMA

    def pad_cols(a):
        a = jnp.asarray(a, jnp.float32)
        return jnp.pad(a, ((0, 0), (0, WV - a.shape[1])))

    # small-parameter slab: 9 (1,E) vectors, ffn_b1 (1,4E), pad_mask (B,T)
    vecs = jnp.concatenate(
        [pad_cols(params[k]) for k in
         ("ln1_g", "ln1_b", "ln2_g", "ln2_b", "ln3_g", "ln3_b",
          "sa_bo", "ca_bo", "ffn_b2")]
        + [pad_cols(params["ffn_b1"]), pad_cols(pad_mask)], axis=0)  # (10+B, 4E)

    # all E-row weight matrices packed into one (E, 12E) slab
    w_slab = jnp.concatenate(
        [params["sa_wq"], params["sa_wk"], params["sa_wv"], params["sa_wo"],
         params["ca_wq"], params["ca_wk"], params["ca_wv"], params["ca_wo"],
         params["ffn_w1"]], axis=1).astype(jnp.float32)

    args = [acts, vecs, w_slab, params["ffn_w2"].astype(jnp.float32)]

    kernel = functools.partial(decoder_layer_kernel, batch=Bv, seqlen=Tv)

    out = pl.pallas_call(
        kernel,
        out_shape=jax.ShapeDtypeStruct((BT, E), jnp.float32),
        grid_spec=pltpu.PrefetchScalarGridSpec(
            num_scalar_prefetch=0,
            grid=(1,),                                # whole problem resident
            in_specs=[pl.BlockSpec(a.shape, lambda i: (0, 0)) for a in args],
            out_specs=pl.BlockSpec((BT, E), lambda i: (0, 0)),
        ),
        compiler_params=pltpu.CompilerParams(
            dimension_semantics=("arbitrary",)),
    )(*args)
    return out.reshape(Bv, Tv, E)


# ------------------------- pure-JAX reference --------------------------------
def _ref_ln(x, g, b):
    mu = jnp.mean(x, axis=-1, keepdims=True)
    var = jnp.mean((x - mu) ** 2, axis=-1, keepdims=True)
    return (x - mu) * jax.lax.rsqrt(var + LN_EPS) * g + b


def _ref_mha(xq, xkv, wq, wk, wv, wo, bo, pad, causal):
    q = xq @ wq
    k = xkv @ wk
    v = xkv @ wv
    scale = float(N_EMBD) ** (-0.5)
    outs = []
    for h in range(NUM_HEADS):
        sl = slice(h * HEAD_DIM, (h + 1) * HEAD_DIM)
        wei = jnp.einsum("bqd,bkd->bqk", q[..., sl], k[..., sl]) * scale
        if causal:
            Tq, Tk = wei.shape[-2], wei.shape[-1]
            tri = jnp.tril(jnp.ones((Tq, Tk), bool))
            wei = jnp.where(tri, wei, -jnp.inf)
        wei = jnp.where(pad[:, None, :] > 0.0, wei, -jnp.inf)
        wei = jax.nn.softmax(wei, axis=-1)
        outs.append(jnp.einsum("bqk,bkd->bqd", wei, v[..., sl]))
    return jnp.concatenate(outs, axis=-1) @ wo + bo


def reference(y, enc, pad, p):
    h1 = _ref_ln(y, p["ln1_g"], p["ln1_b"])
    y = y + _ref_mha(h1, h1, p["sa_wq"], p["sa_wk"], p["sa_wv"],
                     p["sa_wo"], p["sa_bo"], pad, True)
    h2 = _ref_ln(y, p["ln2_g"], p["ln2_b"])
    y = y + _ref_mha(h2, enc, p["ca_wq"], p["ca_wk"], p["ca_wv"],
                     p["ca_wo"], p["ca_bo"], pad, False)
    h3 = _ref_ln(y, p["ln3_g"], p["ln3_b"])
    hid = jnp.maximum(h3 @ p["ffn_w1"] + p["ffn_b1"], 0.0)
    return y + hid @ p["ffn_w2"] + p["ffn_b2"]


# ------------------------------- main -----------------------------------------
if __name__ == "__main__":
    key = jax.random.PRNGKey(0)
    ks = jax.random.split(key, 24)

    def nrm(k, shape, scale=0.02):
        return (scale * jax.random.normal(k, shape)).astype(jnp.float32)

    params = {
        "ln1_g": 1.0 + nrm(ks[0], (1, N_EMBD)), "ln1_b": nrm(ks[1], (1, N_EMBD)),
        "sa_wq": nrm(ks[2], (N_EMBD, N_EMBD)), "sa_wk": nrm(ks[3], (N_EMBD, N_EMBD)),
        "sa_wv": nrm(ks[4], (N_EMBD, N_EMBD)), "sa_wo": nrm(ks[5], (N_EMBD, N_EMBD)),
        "sa_bo": nrm(ks[6], (1, N_EMBD)),
        "ln2_g": 1.0 + nrm(ks[7], (1, N_EMBD)), "ln2_b": nrm(ks[8], (1, N_EMBD)),
        "ca_wq": nrm(ks[9], (N_EMBD, N_EMBD)), "ca_wk": nrm(ks[10], (N_EMBD, N_EMBD)),
        "ca_wv": nrm(ks[11], (N_EMBD, N_EMBD)), "ca_wo": nrm(ks[12], (N_EMBD, N_EMBD)),
        "ca_bo": nrm(ks[13], (1, N_EMBD)),
        "ln3_g": 1.0 + nrm(ks[14], (1, N_EMBD)), "ln3_b": nrm(ks[15], (1, N_EMBD)),
        "ffn_w1": nrm(ks[16], (N_EMBD, 4 * N_EMBD)), "ffn_b1": nrm(ks[17], (1, 4 * N_EMBD)),
        "ffn_w2": nrm(ks[18], (4 * N_EMBD, N_EMBD)), "ffn_b2": nrm(ks[19], (1, N_EMBD)),
    }

    y = jax.random.normal(ks[20], (B, T, N_EMBD), jnp.float32)
    encoder_out = jax.random.normal(ks[21], (B, T, N_EMBD), jnp.float32)
    # pad_mask: 1 = keep, 0 = padded key position (batch 1 has 2 padded slots)
    pad_mask = jnp.array([[1] * T, [1] * (T - 2) + [0, 0]], jnp.float32)

    out = decoder_layer(y, encoder_out, pad_mask, params)
    out = jax.block_until_ready(out)

    ref = reference(y, encoder_out, pad_mask, params)
    assert out.shape == (B, T, N_EMBD)
    assert jnp.allclose(out, ref, atol=1e-4, rtol=1e-4), \
        f"max err {jnp.max(jnp.abs(out - ref))}"

    print("KERNEL_OK")
</pallas_src>

<mosaic_0001>
module attributes {stable_mosaic.version = 11 : i64} {
  func.func @decoder_layer_kernel(%arg0: i32, %arg1: memref<32x32xf32, #tpu.memory_space<vmem>>, %arg2: memref<12x128xf32, #tpu.memory_space<vmem>>, %arg3: memref<32x384xf32, #tpu.memory_space<vmem>>, %arg4: memref<128x32xf32, #tpu.memory_space<vmem>>, %arg5: memref<16x32xf32, #tpu.memory_space<vmem>>) attributes {dimension_semantics = [#tpu.dimension_semantics<arbitrary>], iteration_bounds = array<i64: 1>, scalar_prefetch = 0 : i64, scratch_operands = 0 : i64, tpu.core_type = #tpu.core_type<tc>, window_params = [{pipeline_mode = #tpu.pipeline_mode<synchronous>, transform_indices = @transform_0, window_bounds = array<i64: 32, 32>}, {pipeline_mode = #tpu.pipeline_mode<synchronous>, transform_indices = @transform_1, window_bounds = array<i64: 12, 128>}, {pipeline_mode = #tpu.pipeline_mode<synchronous>, transform_indices = @transform_2, window_bounds = array<i64: 32, 384>}, {pipeline_mode = #tpu.pipeline_mode<synchronous>, transform_indices = @transform_3, window_bounds = array<i64: 128, 32>}, {pipeline_mode = #tpu.pipeline_mode<synchronous>, transform_indices = @transform_4, window_bounds = array<i64: 16, 32>}]} {
    %c0 = arith.constant 0 : index
    %c0_0 = arith.constant 0 : index
    %0 = vector.load %arg2[%c0, %c0_0] : memref<12x128xf32, #tpu.memory_space<vmem>>, vector<12x128xf32>
    %1 = vector.extract_strided_slice %0 {offsets = [0, 0], sizes = [1, 32], strides = [1, 1]} : vector<12x128xf32> to vector<1x32xf32>
    %2 = vector.extract_strided_slice %0 {offsets = [1, 0], sizes = [1, 32], strides = [1, 1]} : vector<12x128xf32> to vector<1x32xf32>
    %3 = vector.extract_strided_slice %0 {offsets = [2, 0], sizes = [1, 32], strides = [1, 1]} : vector<12x128xf32> to vector<1x32xf32>
    %4 = vector.extract_strided_slice %0 {offsets = [3, 0], sizes = [1, 32], strides = [1, 1]} : vector<12x128xf32> to vector<1x32xf32>
    %5 = vector.extract_strided_slice %0 {offsets = [4, 0], sizes = [1, 32], strides = [1, 1]} : vector<12x128xf32> to vector<1x32xf32>
    %6 = vector.extract_strided_slice %0 {offsets = [5, 0], sizes = [1, 32], strides = [1, 1]} : vector<12x128xf32> to vector<1x32xf32>
    %7 = vector.extract_strided_slice %0 {offsets = [6, 0], sizes = [1, 32], strides = [1, 1]} : vector<12x128xf32> to vector<1x32xf32>
    %8 = vector.extract_strided_slice %0 {offsets = [7, 0], sizes = [1, 32], strides = [1, 1]} : vector<12x128xf32> to vector<1x32xf32>
    %9 = vector.extract_strided_slice %0 {offsets = [8, 0], sizes = [1, 32], strides = [1, 1]} : vector<12x128xf32> to vector<1x32xf32>
    %10 = vector.extract_strided_slice %0 {offsets = [9, 0], sizes = [1, 128], strides = [1, 1]} : vector<12x128xf32> to vector<1x128xf32>
    %11 = vector.extract_strided_slice %0 {offsets = [10, 0], sizes = [2, 8], strides = [1, 1]} : vector<12x128xf32> to vector<2x8xf32>
    %c0_1 = arith.constant 0 : index
    %c0_2 = arith.constant 0 : index
    %12 = vector.load %arg1[%c0_1, %c0_2] : memref<32x32xf32, #tpu.memory_space<vmem>>, vector<16x32xf32>
    %c16 = arith.constant 16 : index
    %c0_3 = arith.constant 0 : index
    %13 = vector.load %arg1[%c16, %c0_3] : memref<32x32xf32, #tpu.memory_space<vmem>>, vector<16x32xf32>
    %14 = tpu.iota {dimensions = array<i32: 0>} : vector<8x8xi32>
    %15 = tpu.iota {dimensions = array<i32: 1>} : vector<8x8xi32>
    %16 = arith.cmpi sle, %15, %14 : vector<8x8xi32>
    %cst = arith.constant 0.000000e+00 : f32
    %cst_4 = arith.constant -1.000000e+30 : f32
    %17 = vector.broadcast %cst : f32 to vector<8x8xf32>
    %18 = vector.broadcast %cst_4 : f32 to vector<8x8xf32>
    %19 = arith.select %16, %17, %18 : vector<8x8xi1>, vector<8x8xf32>
    %cst_5 = arith.constant 0.000000e+00 : f32
    %20 = vector.broadcast %cst_5 : f32 to vector<2x8xf32>
    %21 = arith.cmpf ogt, %11, %20 : vector<2x8xf32>
    %cst_6 = arith.constant 0.000000e+00 : f32
    %cst_7 = arith.constant -1.000000e+30 : f32
    %22 = vector.broadcast %cst_6 : f32 to vector<2x8xf32>
    %23 = vector.broadcast %cst_7 : f32 to vector<2x8xf32>
    %24 = arith.select %21, %22, %23 : vector<2x8xi1>, vector<2x8xf32>
    %25 = vector.shape_cast %19 : vector<8x8xf32> to vector<1x8x8xf32>
    %26 = vector.shape_cast %24 : vector<2x8xf32> to vector<2x1x8xf32>
    %27 = vector.broadcast %25 : vector<1x8x8xf32> to vector<2x8x8xf32>
    %28 = vector.broadcast %26 : vector<2x1x8xf32> to vector<2x8x8xf32>
    %29 = arith.addf %27, %28 : vector<2x8x8xf32>
    %30 = vector.shape_cast %24 : vector<2x8xf32> to vector<2x1x8xf32>
    %cst_8 = arith.constant dense<0.000000e+00> : vector<16xf32>
    %31 = vector.multi_reduction <add>, %12, %cst_8 [1] : vector<16x32xf32> to vector<16xf32>
    %32 = vector.shape_cast %31 : vector<16xf32> to vector<16x1xf32>
    %cst_9 = arith.constant 3.200000e+01 : f32
    %33 = vector.broadcast %cst_9 : f32 to vector<16x1xf32>
    %34 = arith.divf %32, %33 : vector<16x1xf32>
    %35 = arith.mulf %12, %12 : vector<16x32xf32>
    %cst_10 = arith.constant dense<0.000000e+00> : vector<16xf32>
    %36 = vector.multi_reduction <add>, %35, %cst_10 [1] : vector<16x32xf32> to vector<16xf32>
    %37 = vector.shape_cast %36 : vector<16xf32> to vector<16x1xf32>
    %cst_11 = arith.constant 3.200000e+01 : f32
    %38 = vector.broadcast %cst_11 : f32 to vector<16x1xf32>
    %39 = arith.divf %37, %38 : vector<16x1xf32>
    %40 = arith.mulf %34, %34 : vector<16x1xf32>
    %41 = arith.subf %39, %40 : vector<16x1xf32>
    %42 = vector.broadcast %34 : vector<16x1xf32> to vector<16x32xf32>
    %43 = arith.subf %12, %42 : vector<16x32xf32>
    %cst_12 = arith.constant 9.99999974E-6 : f32
    %44 = vector.broadcast %cst_12 : f32 to vector<16x1xf32>
    %45 = arith.addf %41, %44 : vector<16x1xf32>
    %46 = math.rsqrt %45 : vector<16x1xf32>
    %47 = vector.broadcast %46 : vector<16x1xf32> to vector<16x32xf32>
    %48 = arith.mulf %43, %47 : vector<16x32xf32>
    %49 = vector.broadcast %1 : vector<1x32xf32> to vector<16x32xf32>
    %50 = arith.mulf %48, %49 : vector<16x32xf32>
    %51 = vector.broadcast %2 : vector<1x32xf32> to vector<16x32xf32>
    %52 = arith.addf %50, %51 : vector<16x32xf32>
    %c0_13 = arith.constant 0 : index
    %c0_14 = arith.constant 0 : index
    %53 = vector.load %arg3[%c0_13, %c0_14] : memref<32x384xf32, #tpu.memory_space<vmem>>, vector<32x96xf32>
    %cst_15 = arith.constant dense<0.000000e+00> : vector<16x96xf32>
    %54 = tpu.matmul %52, %53, %cst_15 {dimension_numbers = #tpu.dot_dimension_numbers<[1], [0], [0], [1], [0, 0, 1, 1], [], []>} : vector<16x32xf32>, vector<32x96xf32>, vector<16x96xf32> -> vector<16x96xf32>
    %55 = vector.extract_strided_slice %54 {offsets = [0, 0], sizes = [16, 32], strides = [1, 1]} : vector<16x96xf32> to vector<16x32xf32>
    %56 = vector.extract_strided_slice %54 {offsets = [0, 32], sizes = [16, 32], strides = [1, 1]} : vector<16x96xf32> to vector<16x32xf32>
    %57 = vector.extract_strided_slice %54 {offsets = [0, 64], sizes = [16, 32], strides = [1, 1]} : vector<16x96xf32> to vector<16x32xf32>
    %c0_16 = arith.constant 0 : index
    %c96 = arith.constant 96 : index
    %58 = vector.load %arg3[%c0_16, %c96] : memref<32x384xf32, #tpu.memory_space<vmem>>, vector<32x32xf32>
    %59 = vector.shape_cast %55 : vector<16x32xf32> to vector<2x8x32xf32>
    %60 = vector.shape_cast %56 : vector<16x32xf32> to vector<2x8x32xf32>
    %61 = vector.shape_cast %57 : vector<16x32xf32> to vector<2x8x32xf32>
    %62 = vector.extract_strided_slice %59 {offsets = [0, 0, 0], sizes = [2, 8, 8], strides = [1, 1, 1]} : vector<2x8x32xf32> to vector<2x8x8xf32>
    %63 = vector.extract_strided_slice %60 {offsets = [0, 0, 0], sizes = [2, 8, 8], strides = [1, 1, 1]} : vector<2x8x32xf32> to vector<2x8x8xf32>
    "tpu.trace_start"() <{level = 10 : i32, message = "bqd,bkd->bqk"}> : () -> ()
    %cst_17 = arith.constant dense<0.000000e+00> : vector<2x8x8xf32>
    %64 = tpu.matmul %62, %63, %cst_17 {dimension_numbers = #tpu.dot_dimension_numbers<[2], [2], [1], [1], [0, 0, 0, 1, 1, 1], [0], [0]>} : vector<2x8x8xf32>, vector<2x8x8xf32>, vector<2x8x8xf32> -> vector<2x8x8xf32>
    "tpu.trace_stop"() : () -> ()
    %cst_18 = arith.constant 0.176776692 : f32
    %65 = vector.broadcast %cst_18 : f32 to vector<2x8x8xf32>
    %66 = arith.mulf %64, %65 : vector<2x8x8xf32>
    %67 = arith.addf %66, %29 : vector<2x8x8xf32>
    %cst_19 = arith.constant dense<0xFF800000> : vector<2x8xf32>
    %68 = vector.multi_reduction <maximumf>, %67, %cst_19 [2] : vector<2x8x8xf32> to vector<2x8xf32>
    %69 = vector.shape_cast %68 : vector<2x8xf32> to vector<2x8x1xf32>
    %70 = vector.broadcast %69 : vector<2x8x1xf32> to vector<2x8x8xf32>
    %71 = arith.subf %67, %70 : vector<2x8x8xf32>
    %72 = math.exp %71 : vector<2x8x8xf32>
    %cst_20 = arith.constant dense<0.000000e+00> : vector<2x8xf32>
    %73 = vector.multi_reduction <add>, %72, %cst_20 [2] : vector<2x8x8xf32> to vector<2x8xf32>
    %74 = vector.shape_cast %73 : vector<2x8xf32> to vector<2x8x1xf32>
    %75 = tpu.reciprocal %74 {approx = true} : vector<2x8x1xf32> -> vector<2x8x1xf32>
    %76 = vector.broadcast %75 : vector<2x8x1xf32> to vector<2x8x8xf32>
    %77 = arith.mulf %72, %76 : vector<2x8x8xf32>
    %78 = vector.extract_strided_slice %61 {offsets = [0, 0, 0], sizes = [2, 8, 8], strides = [1, 1, 1]} : vector<2x8x32xf32> to vector<2x8x8xf32>
    "tpu.trace_start"() <{level = 10 : i32, message = "bqk,bkd->bqd"}> : () -> ()
    %cst_21 = arith.constant dense<0.000000e+00> : vector<2x8x8xf32>
    %79 = tpu.matmul %77, %78, %cst_21 {dimension_numbers = #tpu.dot_dimension_numbers<[2], [1], [1], [2], [0, 0, 0, 1, 1, 2], [0], [0]>} : vector<2x8x8xf32>, vector<2x8x8xf32>, vector<2x8x8xf32> -> vector<2x8x8xf32>
    "tpu.trace_stop"() : () -> ()
    %80 = vector.shape_cast %79 : vector<2x8x8xf32> to vector<16x8xf32>
    %81 = vector.extract_strided_slice %58 {offsets = [0, 0], sizes = [8, 32], strides = [1, 1]} : vector<32x32xf32> to vector<8x32xf32>
    %cst_22 = arith.constant dense<0.000000e+00> : vector<16x32xf32>
    %82 = tpu.matmul %80, %81, %cst_22 {dimension_numbers = #tpu.dot_dimension_numbers<[1], [0], [0], [1], [0, 0, 1, 1], [], []>} : vector<16x8xf32>, vector<8x32xf32>, vector<16x32xf32> -> vector<16x32xf32>
    %83 = vector.extract_strided_slice %59 {offsets = [0, 0, 8], sizes = [2, 8, 8], strides = [1, 1, 1]} : vector<2x8x32xf32> to vector<2x8x8xf32>
    %84 = vector.extract_strided_slice %60 {offsets = [0, 0, 8], sizes = [2, 8, 8], strides = [1, 1, 1]} : vector<2x8x32xf32> to vector<2x8x8xf32>
    "tpu.trace_start"() <{level = 10 : i32, message = "bqd,bkd->bqk"}> : () -> ()
    %cst_23 = arith.constant dense<0.000000e+00> : vector<2x8x8xf32>
    %85 = tpu.matmul %83, %84, %cst_23 {dimension_numbers = #tpu.dot_dimension_numbers<[2], [2], [1], [1], [0, 0, 0, 1, 1, 1], [0], [0]>} : vector<2x8x8xf32>, vector<2x8x8xf32>, vector<2x8x8xf32> -> vector<2x8x8xf32>
    "tpu.trace_stop"() : () -> ()
    %cst_24 = arith.constant 0.176776692 : f32
    %86 = vector.broadcast %cst_24 : f32 to vector<2x8x8xf32>
    %87 = arith.mulf %85, %86 : vector<2x8x8xf32>
    %88 = arith.addf %87, %29 : vector<2x8x8xf32>
    %cst_25 = arith.constant dense<0xFF800000> : vector<2x8xf32>
    %89 = vector.multi_reduction <maximumf>, %88, %cst_25 [2] : vector<2x8x8xf32> to vector<2x8xf32>
    %90 = vector.shape_cast %89 : vector<2x8xf32> to vector<2x8x1xf32>
    %91 = vector.broadcast %90 : vector<2x8x1xf32> to vector<2x8x8xf32>
    %92 = arith.subf %88, %91 : vector<2x8x8xf32>
    %93 = math.exp %92 : vector<2x8x8xf32>
    %cst_26 = arith.constant dense<0.000000e+00> : vector<2x8xf32>
    %94 = vector.multi_reduction <add>, %93, %cst_26 [2] : vector<2x8x8xf32> to vector<2x8xf32>
    %95 = vector.shape_cast %94 : vector<2x8xf32> to vector<2x8x1xf32>
    %96 = tpu.reciprocal %95 {approx = true} : vector<2x8x1xf32> -> vector<2x8x1xf32>
    %97 = vector.broadcast %96 : vector<2x8x1xf32> to vector<2x8x8xf32>
    %98 = arith.mulf %93, %97 : vector<2x8x8xf32>
    %99 = vector.extract_strided_slice %61 {offsets = [0, 0, 8], sizes = [2, 8, 8], strides = [1, 1, 1]} : vector<2x8x32xf32> to vector<2x8x8xf32>
    "tpu.trace_start"() <{level = 10 : i32, message = "bqk,bkd->bqd"}> : () -> ()
    %cst_27 = arith.constant dense<0.000000e+00> : vector<2x8x8xf32>
    %100 = tpu.matmul %98, %99, %cst_27 {dimension_numbers = #tpu.dot_dimension_numbers<[2], [1], [1], [2], [0, 0, 0, 1, 1, 2], [0], [0]>} : vector<2x8x8xf32>, vector<2x8x8xf32>, vector<2x8x8xf32> -> vector<2x8x8xf32>
    "tpu.trace_stop"() : () -> ()
    %101 = vector.shape_cast %100 : vector<2x8x8xf32> to vector<16x8xf32>
    %102 = vector.extract_strided_slice %58 {offsets = [8, 0], sizes = [8, 32], strides = [1, 1]} : vector<32x32xf32> to vector<8x32xf32>
    %cst_28 = arith.constant dense<0.000000e+00> : vector<16x32xf32>
    %103 = tpu.matmul %101, %102, %cst_28 {dimension_numbers = #tpu.dot_dimension_numbers<[1], [0], [0], [1], [0, 0, 1, 1], [], []>} : vector<16x8xf32>, vector<8x32xf32>, vector<16x32xf32> -> vector<16x32xf32>
    %104 = arith.addf %82, %103 : vector<16x32xf32>
    %105 = vector.extract_strided_slice %59 {offsets = [0, 0, 16], sizes = [2, 8, 8], strides = [1, 1, 1]} : vector<2x8x32xf32> to vector<2x8x8xf32>
    %106 = vector.extract_strided_slice %60 {offsets = [0, 0, 16], sizes = [2, 8, 8], strides = [1, 1, 1]} : vector<2x8x32xf32> to vector<2x8x8xf32>
    "tpu.trace_start"() <{level = 10 : i32, message = "bqd,bkd->bqk"}> : () -> ()
    %cst_29 = arith.constant dense<0.000000e+00> : vector<2x8x8xf32>
    %107 = tpu.matmul %105, %106, %cst_29 {dimension_numbers = #tpu.dot_dimension_numbers<[2], [2], [1], [1], [0, 0, 0, 1, 1, 1], [0], [0]>} : vector<2x8x8xf32>, vector<2x8x8xf32>, vector<2x8x8xf32> -> vector<2x8x8xf32>
    "tpu.trace_stop"() : () -> ()
    %cst_30 = arith.constant 0.176776692 : f32
    %108 = vector.broadcast %cst_30 : f32 to vector<2x8x8xf32>
    %109 = arith.mulf %107, %108 : vector<2x8x8xf32>
    %110 = arith.addf %109, %29 : vector<2x8x8xf32>
    %cst_31 = arith.constant dense<0xFF800000> : vector<2x8xf32>
    %111 = vector.multi_reduction <maximumf>, %110, %cst_31 [2] : vector<2x8x8xf32> to vector<2x8xf32>
    %112 = vector.shape_cast %111 : vector<2x8xf32> to vector<2x8x1xf32>
    %113 = vector.broadcast %112 : vector<2x8x1xf32> to vector<2x8x8xf32>
    %114 = arith.subf %110, %113 : vector<2x8x8xf32>
    %115 = math.exp %114 : vector<2x8x8xf32>
    %cst_32 = arith.constant dense<0.000000e+00> : vector<2x8xf32>
    %116 = vector.multi_reduction <add>, %115, %cst_32 [2] : vector<2x8x8xf32> to vector<2x8xf32>
    %117 = vector.shape_cast %116 : vector<2x8xf32> to vector<2x8x1xf32>
    %118 = tpu.reciprocal %117 {approx = true} : vector<2x8x1xf32> -> vector<2x8x1xf32>
    %119 = vector.broadcast %118 : vector<2x8x1xf32> to vector<2x8x8xf32>
    %120 = arith.mulf %115, %119 : vector<2x8x8xf32>
    %121 = vector.extract_strided_slice %61 {offsets = [0, 0, 16], sizes = [2, 8, 8], strides = [1, 1, 1]} : vector<2x8x32xf32> to vector<2x8x8xf32>
    "tpu.trace_start"() <{level = 10 : i32, message = "bqk,bkd->bqd"}> : () -> ()
    %cst_33 = arith.constant dense<0.000000e+00> : vector<2x8x8xf32>
    %122 = tpu.matmul %120, %121, %cst_33 {dimension_numbers = #tpu.dot_dimension_numbers<[2], [1], [1], [2], [0, 0, 0, 1, 1, 2], [0], [0]>} : vector<2x8x8xf32>, vector<2x8x8xf32>, vector<2x8x8xf32> -> vector<2x8x8xf32>
    "tpu.trace_stop"() : () -> ()
    %123 = vector.shape_cast %122 : vector<2x8x8xf32> to vector<16x8xf32>
    %124 = vector.extract_strided_slice %58 {offsets = [16, 0], sizes = [8, 32], strides = [1, 1]} : vector<32x32xf32> to vector<8x32xf32>
    %cst_34 = arith.constant dense<0.000000e+00> : vector<16x32xf32>
    %125 = tpu.matmul %123, %124, %cst_34 {dimension_numbers = #tpu.dot_dimension_numbers<[1], [0], [0], [1], [0, 0, 1, 1], [], []>} : vector<16x8xf32>, vector<8x32xf32>, vector<16x32xf32> -> vector<16x32xf32>
    %126 = arith.addf %104, %125 : vector<16x32xf32>
    %127 = vector.extract_strided_slice %59 {offsets = [0, 0, 24], sizes = [2, 8, 8], strides = [1, 1, 1]} : vector<2x8x32xf32> to vector<2x8x8xf32>
    %128 = vector.extract_strided_slice %60 {offsets = [0, 0, 24], sizes = [2, 8, 8], strides = [1, 1, 1]} : vector<2x8x32xf32> to vector<2x8x8xf32>
    "tpu.trace_start"() <{level = 10 : i32, message = "bqd,bkd->bqk"}> : () -> ()
    %cst_35 = arith.constant dense<0.000000e+00> : vector<2x8x8xf32>
    %129 = tpu.matmul %127, %128, %cst_35 {dimension_numbers = #tpu.dot_dimension_numbers<[2], [2], [1], [1], [0, 0, 0, 1, 1, 1], [0], [0]>} : vector<2x8x8xf32>, vector<2x8x8xf32>, vector<2x8x8xf32> -> vector<2x8x8xf32>
    "tpu.trace_stop"() : () -> ()
    %cst_36 = arith.constant 0.176776692 : f32
    %130 = vector.broadcast %cst_36 : f32 to vector<2x8x8xf32>
    %131 = arith.mulf %129, %130 : vector<2x8x8xf32>
    %132 = arith.addf %131, %29 : vector<2x8x8xf32>
    %cst_37 = arith.constant dense<0xFF800000> : vector<2x8xf32>
    %133 = vector.multi_reduction <maximumf>, %132, %cst_37 [2] : vector<2x8x8xf32> to vector<2x8xf32>
    %134 = vector.shape_cast %133 : vector<2x8xf32> to vector<2x8x1xf32>
    %135 = vector.broadcast %134 : vector<2x8x1xf32> to vector<2x8x8xf32>
    %136 = arith.subf %132, %135 : vector<2x8x8xf32>
    %137 = math.exp %136 : vector<2x8x8xf32>
    %cst_38 = arith.constant dense<0.000000e+00> : vector<2x8xf32>
    %138 = vector.multi_reduction <add>, %137, %cst_38 [2] : vector<2x8x8xf32> to vector<2x8xf32>
    %139 = vector.shape_cast %138 : vector<2x8xf32> to vector<2x8x1xf32>
    %140 = tpu.reciprocal %139 {approx = true} : vector<2x8x1xf32> -> vector<2x8x1xf32>
    %141 = vector.broadcast %140 : vector<2x8x1xf32> to vector<2x8x8xf32>
    %142 = arith.mulf %137, %141 : vector<2x8x8xf32>
    %143 = vector.extract_strided_slice %61 {offsets = [0, 0, 24], sizes = [2, 8, 8], strides = [1, 1, 1]} : vector<2x8x32xf32> to vector<2x8x8xf32>
    "tpu.trace_start"() <{level = 10 : i32, message = "bqk,bkd->bqd"}> : () -> ()
    %cst_39 = arith.constant dense<0.000000e+00> : vector<2x8x8xf32>
    %144 = tpu.matmul %142, %143, %cst_39 {dimension_numbers = #tpu.dot_dimension_numbers<[2], [1], [1], [2], [0, 0, 0, 1, 1, 2], [0], [0]>} : vector<2x8x8xf32>, vector<2x8x8xf32>, vector<2x8x8xf32> -> vector<2x8x8xf32>
    "tpu.trace_stop"() : () -> ()
    %145 = vector.shape_cast %144 : vector<2x8x8xf32> to vector<16x8xf32>
    %146 = vector.extract_strided_slice %58 {offsets = [24, 0], sizes = [8, 32], strides = [1, 1]} : vector<32x32xf32> to vector<8x32xf32>
    %cst_40 = arith.constant dense<0.000000e+00> : vector<16x32xf32>
    %147 = tpu.matmul %145, %146, %cst_40 {dimension_numbers = #tpu.dot_dimension_numbers<[1], [0], [0], [1], [0, 0, 1, 1], [], []>} : vector<16x8xf32>, vector<8x32xf32>, vector<16x32xf32> -> vector<16x32xf32>
    %148 = arith.addf %126, %147 : vector<16x32xf32>
    %149 = vector.broadcast %7 : vector<1x32xf32> to vector<16x32xf32>
    %150 = arith.addf %148, %149 : vector<16x32xf32>
    %151 = arith.addf %12, %150 : vector<16x32xf32>
    %cst_41 = arith.constant dense<0.000000e+00> : vector<16xf32>
    %152 = vector.multi_reduction <add>, %151, %cst_41 [1] : vector<16x32xf32> to vector<16xf32>
    %153 = vector.shape_cast %152 : vector<16xf32> to vector<16x1xf32>
    %cst_42 = arith.constant 3.200000e+01 : f32
    %154 = vector.broadcast %cst_42 : f32 to vector<16x1xf32>
    %155 = arith.divf %153, %154 : vector<16x1xf32>
    %156 = arith.mulf %151, %151 : vector<16x32xf32>
    %cst_43 = arith.constant dense<0.000000e+00> : vector<16xf32>
    %157 = vector.multi_reduction <add>, %156, %cst_43 [1] : vector<16x32xf32> to vector<16xf32>
    %158 = vector.shape_cast %157 : vector<16xf32> to vector<16x1xf32>
    %cst_44 = arith.constant 3.200000e+01 : f32
    %159 = vector.broadcast %cst_44 : f32 to vector<16x1xf32>
    %160 = arith.divf %158, %159 : vector<16x1xf32>
    %161 = arith.mulf %155, %155 : vector<16x1xf32>
    %162 = arith.subf %160, %161 : vector<16x1xf32>
    %163 = vector.broadcast %155 : vector<16x1xf32> to vector<16x32xf32>
    %164 = arith.subf %151, %163 : vector<16x32xf32>
    %cst_45 = arith.constant 9.99999974E-6 : f32
    %165 = vector.broadcast %cst_45 : f32 to vector<16x1xf32>
    %166 = arith.addf %162, %165 : vector<16x1xf32>
    %167 = math.rsqrt %166 : vector<16x1xf32>
    %168 = vector.broadcast %167 : vector<16x1xf32> to vector<16x32xf32>
    %169 = arith.mulf %164, %168 : vector<16x32xf32>
    %170 = vector.broadcast %3 : vector<1x32xf32> to vector<16x32xf32>
    %171 = arith.mulf %169, %170 : vector<16x32xf32>
    %172 = vector.broadcast %4 : vector<1x32xf32> to vector<16x32xf32>
    %173 = arith.addf %171, %172 : vector<16x32xf32>
    %174 = tpu.concatenate %173, %13 in 0 : vector<16x32xf32>, vector<16x32xf32> -> vector<32x32xf32>
    %c0_46 = arith.constant 0 : index
    %c128 = arith.constant 128 : index
    %175 = vector.load %arg3[%c0_46, %c128] : memref<32x384xf32, #tpu.memory_space<vmem>>, vector<32x96xf32>
    %cst_47 = arith.constant dense<0.000000e+00> : vector<32x96xf32>
    %176 = tpu.matmul %174, %175, %cst_47 {dimension_numbers = #tpu.dot_dimension_numbers<[1], [0], [0], [1], [0, 0, 1, 1], [], []>} : vector<32x32xf32>, vector<32x96xf32>, vector<32x96xf32> -> vector<32x96xf32>
    %177 = vector.extract_strided_slice %176 {offsets = [0, 0], sizes = [16, 32], strides = [1, 1]} : vector<32x96xf32> to vector<16x32xf32>
    %178 = vector.extract_strided_slice %176 {offsets = [16, 32], sizes = [16, 32], strides = [1, 1]} : vector<32x96xf32> to vector<16x32xf32>
    %179 = vector.extract_strided_slice %176 {offsets = [16, 64], sizes = [16, 32], strides = [1, 1]} : vector<32x96xf32> to vector<16x32xf32>
    %c0_48 = arith.constant 0 : index
    %c224 = arith.constant 224 : index
    %180 = vector.load %arg3[%c0_48, %c224] : memref<32x384xf32, #tpu.memory_space<vmem>>, vector<32x32xf32>
    %181 = vector.shape_cast %177 : vector<16x32xf32> to vector<2x8x32xf32>
    %182 = vector.shape_cast %178 : vector<16x32xf32> to vector<2x8x32xf32>
    %183 = vector.shape_cast %179 : vector<16x32xf32> to vector<2x8x32xf32>
    %184 = vector.extract_strided_slice %181 {offsets = [0, 0, 0], sizes = [2, 8, 8], strides = [1, 1, 1]} : vector<2x8x32xf32> to vector<2x8x8xf32>
    %185 = vector.extract_strided_slice %182 {offsets = [0, 0, 0], sizes = [2, 8, 8], strides = [1, 1, 1]} : vector<2x8x32xf32> to vector<2x8x8xf32>
    "tpu.trace_start"() <{level = 10 : i32, message = "bqd,bkd->bqk"}> : () -> ()
    %cst_49 = arith.constant dense<0.000000e+00> : vector<2x8x8xf32>
    %186 = tpu.matmul %184, %185, %cst_49 {dimension_numbers = #tpu.dot_dimension_numbers<[2], [2], [1], [1], [0, 0, 0, 1, 1, 1], [0], [0]>} : vector<2x8x8xf32>, vector<2x8x8xf32>, vector<2x8x8xf32> -> vector<2x8x8xf32>
    "tpu.trace_stop"() : () -> ()
    %cst_50 = arith.constant 0.176776692 : f32
    %187 = vector.broadcast %cst_50 : f32 to vector<2x8x8xf32>
    %188 = arith.mulf %186, %187 : vector<2x8x8xf32>
    %189 = vector.broadcast %30 : vector<2x1x8xf32> to vector<2x8x8xf32>
    %190 = arith.addf %188, %189 : vector<2x8x8xf32>
    %cst_51 = arith.constant dense<0xFF800000> : vector<2x8xf32>
    %191 = vector.multi_reduction <maximumf>, %190, %cst_51 [2] : vector<2x8x8xf32> to vector<2x8xf32>
    %192 = vector.shape_cast %191 : vector<2x8xf32> to vector<2x8x1xf32>
    %193 = vector.broadcast %192 : vector<2x8x1xf32> to vector<2x8x8xf32>
    %194 = arith.subf %190, %193 : vector<2x8x8xf32>
    %195 = math.exp %194 : vector<2x8x8xf32>
    %cst_52 = arith.constant dense<0.000000e+00> : vector<2x8xf32>
    %196 = vector.multi_reduction <add>, %195, %cst_52 [2] : vector<2x8x8xf32> to vector<2x8xf32>
    %197 = vector.shape_cast %196 : vector<2x8xf32> to vector<2x8x1xf32>
    %198 = tpu.reciprocal %197 {approx = true} : vector<2x8x1xf32> -> vector<2x8x1xf32>
    %199 = vector.broadcast %198 : vector<2x8x1xf32> to vector<2x8x8xf32>
    %200 = arith.mulf %195, %199 : vector<2x8x8xf32>
    %201 = vector.extract_strided_slice %183 {offsets = [0, 0, 0], sizes = [2, 8, 8], strides = [1, 1, 1]} : vector<2x8x32xf32> to vector<2x8x8xf32>
    "tpu.trace_start"() <{level = 10 : i32, message = "bqk,bkd->bqd"}> : () -> ()
    %cst_53 = arith.constant dense<0.000000e+00> : vector<2x8x8xf32>
    %202 = tpu.matmul %200, %201, %cst_53 {dimension_numbers = #tpu.dot_dimension_numbers<[2], [1], [1], [2], [0, 0, 0, 1, 1, 2], [0], [0]>} : vector<2x8x8xf32>, vector<2x8x8xf32>, vector<2x8x8xf32> -> vector<2x8x8xf32>
    "tpu.trace_stop"() : () -> ()
    %203 = vector.shape_cast %202 : vector<2x8x8xf32> to vector<16x8xf32>
    %204 = vector.extract_strided_slice %180 {offsets = [0, 0], sizes = [8, 32], strides = [1, 1]} : vector<32x32xf32> to vector<8x32xf32>
    %cst_54 = arith.constant dense<0.000000e+00> : vector<16x32xf32>
    %205 = tpu.matmul %203, %204, %cst_54 {dimension_numbers = #tpu.dot_dimension_numbers<[1], [0], [0], [1], [0, 0, 1, 1], [], []>} : vector<16x8xf32>, vector<8x32xf32>, vector<16x32xf32> -> vector<16x32xf32>
    %206 = vector.extract_strided_slice %181 {offsets = [0, 0, 8], sizes = [2, 8, 8], strides = [1, 1, 1]} : vector<2x8x32xf32> to vector<2x8x8xf32>
    %207 = vector.extract_strided_slice %182 {offsets = [0, 0, 8], sizes = [2, 8, 8], strides = [1, 1, 1]} : vector<2x8x32xf32> to vector<2x8x8xf32>
    "tpu.trace_start"() <{level = 10 : i32, message = "bqd,bkd->bqk"}> : () -> ()
    %cst_55 = arith.constant dense<0.000000e+00> : vector<2x8x8xf32>
    %208 = tpu.matmul %206, %207, %cst_55 {dimension_numbers = #tpu.dot_dimension_numbers<[2], [2], [1], [1], [0, 0, 0, 1, 1, 1], [0], [0]>} : vector<2x8x8xf32>, vector<2x8x8xf32>, vector<2x8x8xf32> -> vector<2x8x8xf32>
    "tpu.trace_stop"() : () -> ()
    %cst_56 = arith.constant 0.176776692 : f32
    %209 = vector.broadcast %cst_56 : f32 to vector<2x8x8xf32>
    %210 = arith.mulf %208, %209 : vector<2x8x8xf32>
    %211 = vector.broadcast %30 : vector<2x1x8xf32> to vector<2x8x8xf32>
    %212 = arith.addf %210, %211 : vector<2x8x8xf32>
    %cst_57 = arith.constant dense<0xFF800000> : vector<2x8xf32>
    %213 = vector.multi_reduction <maximumf>, %212, %cst_57 [2] : vector<2x8x8xf32> to vector<2x8xf32>
    %214 = vector.shape_cast %213 : vector<2x8xf32> to vector<2x8x1xf32>
    %215 = vector.broadcast %214 : vector<2x8x1xf32> to vector<2x8x8xf32>
    %216 = arith.subf %212, %215 : vector<2x8x8xf32>
    %217 = math.exp %216 : vector<2x8x8xf32>
    %cst_58 = arith.constant dense<0.000000e+00> : vector<2x8xf32>
    %218 = vector.multi_reduction <add>, %217, %cst_58 [2] : vector<2x8x8xf32> to vector<2x8xf32>
    %219 = vector.shape_cast %218 : vector<2x8xf32> to vector<2x8x1xf32>
    %220 = tpu.reciprocal %219 {approx = true} : vector<2x8x1xf32> -> vector<2x8x1xf32>
    %221 = vector.broadcast %220 : vector<2x8x1xf32> to vector<2x8x8xf32>
    %222 = arith.mulf %217, %221 : vector<2x8x8xf32>
    %223 = vector.extract_strided_slice %183 {offsets = [0, 0, 8], sizes = [2, 8, 8], strides = [1, 1, 1]} : vector<2x8x32xf32> to vector<2x8x8xf32>
    "tpu.trace_start"() <{level = 10 : i32, message = "bqk,bkd->bqd"}> : () -> ()
    %cst_59 = arith.constant dense<0.000000e+00> : vector<2x8x8xf32>
    %224 = tpu.matmul %222, %223, %cst_59 {dimension_numbers = #tpu.dot_dimension_numbers<[2], [1], [1], [2], [0, 0, 0, 1, 1, 2], [0], [0]>} : vector<2x8x8xf32>, vector<2x8x8xf32>, vector<2x8x8xf32> -> vector<2x8x8xf32>
    "tpu.trace_stop"() : () -> ()
    %225 = vector.shape_cast %224 : vector<2x8x8xf32> to vector<16x8xf32>
    %226 = vector.extract_strided_slice %180 {offsets = [8, 0], sizes = [8, 32], strides = [1, 1]} : vector<32x32xf32> to vector<8x32xf32>
    %cst_60 = arith.constant dense<0.000000e+00> : vector<16x32xf32>
    %227 = tpu.matmul %225, %226, %cst_60 {dimension_numbers = #tpu.dot_dimension_numbers<[1], [0], [0], [1], [0, 0, 1, 1], [], []>} : vector<16x8xf32>, vector<8x32xf32>, vector<16x32xf32> -> vector<16x32xf32>
    %228 = arith.addf %205, %227 : vector<16x32xf32>
    %229 = vector.extract_strided_slice %181 {offsets = [0, 0, 16], sizes = [2, 8, 8], strides = [1, 1, 1]} : vector<2x8x32xf32> to vector<2x8x8xf32>
    %230 = vector.extract_strided_slice %182 {offsets = [0, 0, 16], sizes = [2, 8, 8], strides = [1, 1, 1]} : vector<2x8x32xf32> to vector<2x8x8xf32>
    "tpu.trace_start"() <{level = 10 : i32, message = "bqd,bkd->bqk"}> : () -> ()
    %cst_61 = arith.constant dense<0.000000e+00> : vector<2x8x8xf32>
    %231 = tpu.matmul %229, %230, %cst_61 {dimension_numbers = #tpu.dot_dimension_numbers<[2], [2], [1], [1], [0, 0, 0, 1, 1, 1], [0], [0]>} : vector<2x8x8xf32>, vector<2x8x8xf32>, vector<2x8x8xf32> -> vector<2x8x8xf32>
    "tpu.trace_stop"() : () -> ()
    %cst_62 = arith.constant 0.176776692 : f32
    %232 = vector.broadcast %cst_62 : f32 to vector<2x8x8xf32>
    %233 = arith.mulf %231, %232 : vector<2x8x8xf32>
    %234 = vector.broadcast %30 : vector<2x1x8xf32> to vector<2x8x8xf32>
    %235 = arith.addf %233, %234 : vector<2x8x8xf32>
    %cst_63 = arith.constant dense<0xFF800000> : vector<2x8xf32>
    %236 = vector.multi_reduction <maximumf>, %235, %cst_63 [2] : vector<2x8x8xf32> to vector<2x8xf32>
    %237 = vector.shape_cast %236 : vector<2x8xf32> to vector<2x8x1xf32>
    %238 = vector.broadcast %237 : vector<2x8x1xf32> to vector<2x8x8xf32>
    %239 = arith.subf %235, %238 : vector<2x8x8xf32>
    %240 = math.exp %239 : vector<2x8x8xf32>
    %cst_64 = arith.constant dense<0.000000e+00> : vector<2x8xf32>
    %241 = vector.multi_reduction <add>, %240, %cst_64 [2] : vector<2x8x8xf32> to vector<2x8xf32>
    %242 = vector.shape_cast %241 : vector<2x8xf32> to vector<2x8x1xf32>
    %243 = tpu.reciprocal %242 {approx = true} : vector<2x8x1xf32> -> vector<2x8x1xf32>
    %244 = vector.broadcast %243 : vector<2x8x1xf32> to vector<2x8x8xf32>
    %245 = arith.mulf %240, %244 : vector<2x8x8xf32>
    %246 = vector.extract_strided_slice %183 {offsets = [0, 0, 16], sizes = [2, 8, 8], strides = [1, 1, 1]} : vector<2x8x32xf32> to vector<2x8x8xf32>
    "tpu.trace_start"() <{level = 10 : i32, message = "bqk,bkd->bqd"}> : () -> ()
    %cst_65 = arith.constant dense<0.000000e+00> : vector<2x8x8xf32>
    %247 = tpu.matmul %245, %246, %cst_65 {dimension_numbers = #tpu.dot_dimension_numbers<[2], [1], [1], [2], [0, 0, 0, 1, 1, 2], [0], [0]>} : vector<2x8x8xf32>, vector<2x8x8xf32>, vector<2x8x8xf32> -> vector<2x8x8xf32>
    "tpu.trace_stop"() : () -> ()
    %248 = vector.shape_cast %247 : vector<2x8x8xf32> to vector<16x8xf32>
    %249 = vector.extract_strided_slice %180 {offsets = [16, 0], sizes = [8, 32], strides = [1, 1]} : vector<32x32xf32> to vector<8x32xf32>
    %cst_66 = arith.constant dense<0.000000e+00> : vector<16x32xf32>
    %250 = tpu.matmul %248, %249, %cst_66 {dimension_numbers = #tpu.dot_dimension_numbers<[1], [0], [0], [1], [0, 0, 1, 1], [], []>} : vector<16x8xf32>, vector<8x32xf32>, vector<16x32xf32> -> vector<16x32xf32>
    %251 = arith.addf %228, %250 : vector<16x32xf32>
    %252 = vector.extract_strided_slice %181 {offsets = [0, 0, 24], sizes = [2, 8, 8], strides = [1, 1, 1]} : vector<2x8x32xf32> to vector<2x8x8xf32>
    %253 = vector.extract_strided_slice %182 {offsets = [0, 0, 24], sizes = [2, 8, 8], strides = [1, 1, 1]} : vector<2x8x32xf32> to vector<2x8x8xf32>
    "tpu.trace_start"() <{level = 10 : i32, message = "bqd,bkd->bqk"}> : () -> ()
    %cst_67 = arith.constant dense<0.000000e+00> : vector<2x8x8xf32>
    %254 = tpu.matmul %252, %253, %cst_67 {dimension_numbers = #tpu.dot_dimension_numbers<[2], [2], [1], [1], [0, 0, 0, 1, 1, 1], [0], [0]>} : vector<2x8x8xf32>, vector<2x8x8xf32>, vector<2x8x8xf32> -> vector<2x8x8xf32>
    "tpu.trace_stop"() : () -> ()
    %cst_68 = arith.constant 0.176776692 : f32
    %255 = vector.broadcast %cst_68 : f32 to vector<2x8x8xf32>
    %256 = arith.mulf %254, %255 : vector<2x8x8xf32>
    %257 = vector.broadcast %30 : vector<2x1x8xf32> to vector<2x8x8xf32>
    %258 = arith.addf %256, %257 : vector<2x8x8xf32>
    %cst_69 = arith.constant dense<0xFF800000> : vector<2x8xf32>
    %259 = vector.multi_reduction <maximumf>, %258, %cst_69 [2] : vector<2x8x8xf32> to vector<2x8xf32>
    %260 = vector.shape_cast %259 : vector<2x8xf32> to vector<2x8x1xf32>
    %261 = vector.broadcast %260 : vector<2x8x1xf32> to vector<2x8x8xf32>
    %262 = arith.subf %258, %261 : vector<2x8x8xf32>
    %263 = math.exp %262 : vector<2x8x8xf32>
    %cst_70 = arith.constant dense<0.000000e+00> : vector<2x8xf32>
    %264 = vector.multi_reduction <add>, %263, %cst_70 [2] : vector<2x8x8xf32> to vector<2x8xf32>
    %265 = vector.shape_cast %264 : vector<2x8xf32> to vector<2x8x1xf32>
    %266 = tpu.reciprocal %265 {approx = true} : vector<2x8x1xf32> -> vector<2x8x1xf32>
    %267 = vector.broadcast %266 : vector<2x8x1xf32> to vector<2x8x8xf32>
    %268 = arith.mulf %263, %267 : vector<2x8x8xf32>
    %269 = vector.extract_strided_slice %183 {offsets = [0, 0, 24], sizes = [2, 8, 8], strides = [1, 1, 1]} : vector<2x8x32xf32> to vector<2x8x8xf32>
    "tpu.trace_start"() <{level = 10 : i32, message = "bqk,bkd->bqd"}> : () -> ()
    %cst_71 = arith.constant dense<0.000000e+00> : vector<2x8x8xf32>
    %270 = tpu.matmul %268, %269, %cst_71 {dimension_numbers = #tpu.dot_dimension_numbers<[2], [1], [1], [2], [0, 0, 0, 1, 1, 2], [0], [0]>} : vector<2x8x8xf32>, vector<2x8x8xf32>, vector<2x8x8xf32> -> vector<2x8x8xf32>
    "tpu.trace_stop"() : () -> ()
    %271 = vector.shape_cast %270 : vector<2x8x8xf32> to vector<16x8xf32>
    %272 = vector.extract_strided_slice %180 {offsets = [24, 0], sizes = [8, 32], strides = [1, 1]} : vector<32x32xf32> to vector<8x32xf32>
    %cst_72 = arith.constant dense<0.000000e+00> : vector<16x32xf32>
    %273 = tpu.matmul %271, %272, %cst_72 {dimension_numbers = #tpu.dot_dimension_numbers<[1], [0], [0], [1], [0, 0, 1, 1], [], []>} : vector<16x8xf32>, vector<8x32xf32>, vector<16x32xf32> -> vector<16x32xf32>
    %274 = arith.addf %251, %273 : vector<16x32xf32>
    %275 = vector.broadcast %8 : vector<1x32xf32> to vector<16x32xf32>
    %276 = arith.addf %274, %275 : vector<16x32xf32>
    %277 = arith.addf %151, %276 : vector<16x32xf32>
    %cst_73 = arith.constant dense<0.000000e+00> : vector<16xf32>
    %278 = vector.multi_reduction <add>, %277, %cst_73 [1] : vector<16x32xf32> to vector<16xf32>
    %279 = vector.shape_cast %278 : vector<16xf32> to vector<16x1xf32>
    %cst_74 = arith.constant 3.200000e+01 : f32
    %280 = vector.broadcast %cst_74 : f32 to vector<16x1xf32>
    %281 = arith.divf %279, %280 : vector<16x1xf32>
    %282 = arith.mulf %277, %277 : vector<16x32xf32>
    %cst_75 = arith.constant dense<0.000000e+00> : vector<16xf32>
    %283 = vector.multi_reduction <add>, %282, %cst_75 [1] : vector<16x32xf32> to vector<16xf32>
    %284 = vector.shape_cast %283 : vector<16xf32> to vector<16x1xf32>
    %cst_76 = arith.constant 3.200000e+01 : f32
    %285 = vector.broadcast %cst_76 : f32 to vector<16x1xf32>
    %286 = arith.divf %284, %285 : vector<16x1xf32>
    %287 = arith.mulf %281, %281 : vector<16x1xf32>
    %288 = arith.subf %286, %287 : vector<16x1xf32>
    %289 = vector.broadcast %281 : vector<16x1xf32> to vector<16x32xf32>
    %290 = arith.subf %277, %289 : vector<16x32xf32>
    %cst_77 = arith.constant 9.99999974E-6 : f32
    %291 = vector.broadcast %cst_77 : f32 to vector<16x1xf32>
    %292 = arith.addf %288, %291 : vector<16x1xf32>
    %293 = math.rsqrt %292 : vector<16x1xf32>
    %294 = vector.broadcast %293 : vector<16x1xf32> to vector<16x32xf32>
    %295 = arith.mulf %290, %294 : vector<16x32xf32>
    %296 = vector.broadcast %5 : vector<1x32xf32> to vector<16x32xf32>
    %297 = arith.mulf %295, %296 : vector<16x32xf32>
    %298 = vector.broadcast %6 : vector<1x32xf32> to vector<16x32xf32>
    %299 = arith.addf %297, %298 : vector<16x32xf32>
    %c0_78 = arith.constant 0 : index
    %c256 = arith.constant 256 : index
    %300 = vector.load %arg3[%c0_78, %c256] : memref<32x384xf32, #tpu.memory_space<vmem>>, vector<32x128xf32>
    %cst_79 = arith.constant dense<0.000000e+00> : vector<16x128xf32>
    %301 = tpu.matmul %299, %300, %cst_79 {dimension_numbers = #tpu.dot_dimension_numbers<[1], [0], [0], [1], [0, 0, 1, 1], [], []>} : vector<16x32xf32>, vector<32x128xf32>, vector<16x128xf32> -> vector<16x128xf32>
    %302 = vector.broadcast %10 : vector<1x128xf32> to vector<16x128xf32>
    %303 = arith.addf %301, %302 : vector<16x128xf32>
    %cst_80 = arith.constant 0.000000e+00 : f32
    %304 = vector.broadcast %cst_80 : f32 to vector<16x128xf32>
    %305 = arith.maximumf %303, %304 : vector<16x128xf32>
    %c0_81 = arith.constant 0 : index
    %c0_82 = arith.constant 0 : index
    %306 = vector.load %arg4[%c0_81, %c0_82] : memref<128x32xf32, #tpu.memory_space<vmem>>, vector<128x32xf32>
    %cst_83 = arith.constant dense<0.000000e+00> : vector<16x32xf32>
    %307 = tpu.matmul %305, %306, %cst_83 {dimension_numbers = #tpu.dot_dimension_numbers<[1], [0], [0], [1], [0, 0, 1, 1], [], []>} : vector<16x128xf32>, vector<128x32xf32>, vector<16x32xf32> -> vector<16x32xf32>
    %308 = arith.addf %277, %307 : vector<16x32xf32>
    %309 = vector.broadcast %9 : vector<1x32xf32> to vector<16x32xf32>
    %310 = arith.addf %308, %309 : vector<16x32xf32>
    %c0_84 = arith.constant 0 : index
    %c0_85 = arith.constant 0 : index
    %311 = vector.load %arg5[%c0_84, %c0_85] : memref<16x32xf32, #tpu.memory_space<vmem>>, vector<16x32xf32>
    tpu.vector_store %arg5[%c0_84, %c0_85], %310 {strides = array<i32>} : memref<16x32xf32, #tpu.memory_space<vmem>>, vector<16x32xf32>,
    return
  }
  func.func @transform_0(%arg0: i32) -> (i32, i32) {
    %c0_i32 = arith.constant 0 : i32
    %c0_i32_0 = arith.constant 0 : i32
    %c0_i32_1 = arith.constant 0 : i32
    return %c0_i32, %c0_i32_0 : i32, i32
  }
  func.func @transform_1(%arg0: i32) -> (i32, i32) {
    %c0_i32 = arith.constant 0 : i32
    %c0_i32_0 = arith.constant 0 : i32
    %c0_i32_1 = arith.constant 0 : i32
    return %c0_i32, %c0_i32_0 : i32, i32
  }
  func.func @transform_2(%arg0: i32) -> (i32, i32) {
    %c0_i32 = arith.constant 0 : i32
    %c0_i32_0 = arith.constant 0 : i32
    %c0_i32_1 = arith.constant 0 : i32
    return %c0_i32, %c0_i32_0 : i32, i32
  }
  func.func @transform_3(%arg0: i32) -> (i32, i32) {
    %c0_i32 = arith.constant 0 : i32
    %c0_i32_0 = arith.constant 0 : i32
    %c0_i32_1 = arith.constant 0 : i32
    return %c0_i32, %c0_i32_0 : i32, i32
  }
  func.func @transform_4(%arg0: i32) -> (i32, i32) {
    %c0_i32 = arith.constant 0 : i32
    %c0_i32_0 = arith.constant 0 : i32
    %c0_i32_1 = arith.constant 0 : i32
    return %c0_i32, %c0_i32_0 : i32, i32
  }
}

</mosaic_0001>

<bundles_post_ra>
// kernel: tpu_custom_call.1
= control target key start
LH: loop header
LB: loop body
LE: loop exit
PB: predicated region body
PF: predicated region fallthrough
CT: control target
= control target key end

     0   :  { %vm69_vm0 = vcmask 261120   ;;  %s5207_s0 = inlined_call_operand.vmem [shape: f32[32,32], index: 0, kind: input, shape index: {}]   ;;  %s5208_s1 = inlined_call_operand.vmem [shape: f32[12,128], index: 1, kind: input, shape index: {}]   ;;  %s5209_s2 = inlined_call_operand.vmem [shape: f32[32,384], index: 2, kind: input, shape index: {}]   ;;  %s5210_s3 = inlined_call_operand.vmem [shape: f32[128,32], index: 3, kind: input, shape index: {}]   ;;  %s5211_s4 = inlined_call_operand.hbm [shape: f32[16,32], index: 4, kind: output, shape index: {}]  }
   0x1   :  { %v4601_v0 = vld [vmem:[%s5207_s0] sm:$0xff]  ;;  %v4606_v1 = vld [vmem:[%s5207_s0 + $0x8] sm:$0xff] }
   0x2   :  { %9 = vsyncpa [#allocation3], 0  ;;  %v70_v2 = vsel %vm69_vm0, %v4601_v0, 0.0  ;;  %v79_v3 = vmul.f32 %v4601_v0, %v4601_v0  ;;  %v80_v4 = vmul.f32 %v4606_v1, %v4606_v1  ;;  %v73_v6 = vsel %vm69_vm0, %v4606_v1, 0.0  ;;  %v4621_v8 = vld [vmem:[%s5209_s2 + $0x48] sm:$0xff]  ;;  %v4626_v9 = vld [vmem:[%s5209_s2 + $0x30] sm:$0xff] }
   0x3   :  { %71 = vadd.xlane.f32.xlu0 %v70_v2  ;;  %4164 = vmatprep.subr.mxu0 %v4621_v8  ;;  %v4633_v10 = vld [vmem:[%s5209_s2 + $0x18] sm:$0xff]  ;;  %v4642_v11 = vld [vmem:[%s5209_s2] sm:$0xff]  ;;  %v24_v25 = vlaneseq  ;;  %v4554_v43 = vmov 0.0   ;;  %vm4555_vm1 = vmmov 0   ;;  %s4556_s29 = smov 96   ;;  %vm201_vm2 = vcmask 64512  }
   0x4   :  { %v81_v5 = vsel %vm69_vm0, %v79_v3, 0.0  ;;  %v84_v7 = vsel %vm69_vm0, %v80_v4, 0.0  ;;  %4165 = vmatpush3.msra.mxu0 %v4621_v8  ;;  %v4654_v29 = vld [vmem:[%s5208_s1] sm:$0xff]  ;;  %4175 = vmatprep.subr.mxu1 %v4554_v43  ;;  %v4557_v48 = vmov 1966171168   ;;  %s4559_s6 = smov 64  }
   0x5   :  { %82 = vadd.xlane.f32.xlu1 %v81_v5  ;;  %4166 = vmatprep.subr.mxu0 %v4626_v9  ;;  %v4646_v27 = vshrl.u32 %v24_v25, 7  ;;  %v34_v49 = vunpack.c.l.s4 %v4557_v48  ;;  %v19_v50 = vld [vmem:[%s5208_s1 + $0x8] sm:$0xf]  ;;  %v4558_v53 = vmov -1e+30   ;;  %v27_v58 = vand.u32 127, %v24_v25 }
   0x6   :  { %4167 = vmatpush3.msra.mxu0 %v4626_v9  ;;  %4177 = vmatprep.mubr.msk.f32.mxu1 %vm4555_vm1, %v4554_v43  ;;  %vm30_vm3 = vcmp.gt.f32.partialorder %v19_v50, 0.0  ;;  %s4560_s7 = smov 88   ;;  %s4561_s8 = smov 120  }
   0x7   :  { %74 = vadd.xlane.f32.xlu0 %v73_v6  ;;  %4168 = vmatprep.subr.mxu0 %v4633_v10  ;;  %v4649_v28 = vsub.s32 0, %v4646_v27  ;;  %v109_v30 = vsub.s32 1, %v4646_v27  ;;  %v35_v51 = vunpack.c.0.s8 %v34_v49  ;;  %v31_v54 = vsel %vm30_vm3, 0.0, %v4558_v53  ;;  %s4562_s9 = smov 56   ;;  %s4563_s10 = smov 32  }
   0x8   :  { %4169 = vmatpush3.msra.mxu0 %v4633_v10  ;;  %vm28_vm4 = vcmp.le.s32.totalorder %v27_v58, %v4646_v27  ;;  %s4564_s11 = smov 80   ;;  %s4565_s12 = smov 112  }
   0x9   :  { %85 = vadd.xlane.f32.xlu1 %v84_v7  ;;  %4170 = vmatprep.subr.mxu0 %v4642_v11  ;;  %v104_v32 = vrot.slane %v4654_v29, %v4649_v28  ;;  %v110_v35 = vrot.slane %v4654_v29, %v109_v30  ;;  %v38_v52 = vsub.s32 %v35_v51, %v4646_v27  ;;  %v29_v63 = vsel %vm28_vm4, 0.0, %v4558_v53  ;;  %s4566_s13 = smov 48   ;;  %s4567_s14 = smov 72  }
   0xa   :  { %4171 = vmatpush3.msra.mxu0 %v4642_v11  ;;  %s4568_s15 = smov 104   ;;  %s4569_s16 = smov 40  }
   0xb   :  { %4185 = vmatprep.subr.mxu0 %v4554_v43  ;;  %v39_v55 = vrot.slane %v31_v54, %v38_v52 }
   0xd   :  { %v40_v56 = vcombine.high %v39_v55, %v39_v55  ;;  %v47_v57 = vrot.slane %v39_v55, %v38_v52 }
   0xf   :  { %v54_v59 = vrot.slane %v40_v56, %v38_v52  ;;  %v55_v60 = vcombine.high %v47_v57, %v47_v57 }
  0x11   :  { %v56_v61 = vcombine.high %v54_v59, %v54_v59  ;;  %v4698_v62 = vrot.slane %v55_v60, %v4649_v28 }
  0x13   :  { %v4701_v2 = vrot.slane %v56_v61, %v4649_v28  ;;  %v4704_v3 = vadd.f32 %v4698_v62, %v29_v63 }
  0x8c   :  { %v72_v12 = vpop.xlane.xlu0 %71 }
  0x8d   :  { %v77_v13 = vmul.f32 0.03125, %v72_v12  ;;  %v4708_v12 = vadd.f32 %v4701_v2, %v29_v63 }
  0x8e   :  { %v83_v14 = vpop.xlane.xlu1 %82 }
  0x8f   :  { %v89_v15 = vmul.f32 %v77_v13, %v77_v13  ;;  %v87_v16 = vmul.f32 0.03125, %v83_v14  ;;  %v93_v31 = vsub.f32 %v4601_v0, %v77_v13 }
  0x90   :  { %v75_v17 = vpop.xlane.xlu0 %74 }
  0x91   :  { %v91_v18 = vsub.f32 %v87_v16, %v89_v15  ;;  %v78_v19 = vmul.f32 0.03125, %v75_v17 }
  0x92   :  { %v86_v20 = vpop.xlane.xlu1 %85 }
  0x93   :  { %v95_v21 = vadd.f32 1e-05, %v91_v18  ;;  %v90_v22 = vmul.f32 %v78_v19, %v78_v19  ;;  %v88_v23 = vmul.f32 0.03125, %v86_v20  ;;  %v94_v36 = vsub.f32 %v4606_v1, %v78_v19 }
  0x95   :  { %4454 = vrsqrt.f32 %v95_v21  ;;  %v92_v24 = vsub.f32 %v88_v23, %v90_v22 }
  0x97   :  { %v96_v26 = vadd.f32 1e-05, %v92_v24 }
  0x99   :  { %4456 = vrsqrt.f32 %v96_v26 }
  0xa2   :  { %v4455_v33 = vpop.eup %4454 }
  0xa3   :  { %v99_v34 = vmul.f32 %v4455_v33, %v93_v31 }
  0xa5   :  { %v105_v37 = vmul.f32 %v104_v32, %v99_v34 }
  0xa6   :  { %v4457_v38 = vpop.eup %4456 }
  0xa7   :  { %v100_v39 = vmul.f32 %v4457_v38, %v94_v36  ;;  %v111_v40 = vadd.f32 %v110_v35, %v105_v37 }
  0xa9   :  { %v106_v41 = vmul.f32 %v104_v32, %v100_v39  ;;  %4172 = vmatprep.mubr.msk.f32.mxu0 %vm69_vm0, %v111_v40 }
  0xab   :  { %v112_v42 = vadd.f32 %v110_v35, %v106_v41 }
  0xad   :  { %4173 = vmatmul.mubr.msk.f32.vlgmr.msra.gmra.mxu0 %vm69_vm0, %v112_v42 }
  0xae   :  { %4187 = vmatprep.mubr.msk.f32.mxu0 %vm4555_vm1, %v4554_v43 }
 0x16d   :  { %v4672_v44 = vpop.f32.mrf.mxu0 }
 0x16e   :  { %277 = vrot.lane.b32.xlu1 %v4672_v44, %s4556_s29 }
 0x16f   :  { %v4676_v45 = vpop.f32.mrf.mxu0 }
 0x170   :  { %199 = vrot.lane.b32.xlu0 %v4676_v45, %s4556_s29 }
 0x1e0   :  { %v278_v47 = vpop.permute.xlu1 %277 }
 0x1e2   :  { %v200_v46 = vpop.permute.xlu0 %199 }
 0x1e3   :  { %4176 = vmatpush3.xpose.msk.msra.mxu1 %vm201_vm2, %v200_v46 }
 0x1e4   :  { %4180 = vmatprep.subr.mxu1 %v4554_v43 }
 0x1e6   :  { %4178 = vmatmul.mubr.msk.f32.vlgmr.msra.gmra.mxu1 %vm201_vm2, %v4676_v45 }
 0x1e7   :  { %4181 = vmatpush3.xpose.msk.msra.mxu1 %vm201_vm2, %v278_v47  ;;  %4182 = vmatprep.mubr.msk.f32.mxu1 %vm4555_vm1, %v4554_v43 }
 0x1e8   :  { %4190 = vmatprep.subr.mxu1 %v4554_v43 }
 0x1ea   :  { %4183 = vmatmul.mubr.msk.f32.vlgmr.msra.gmra.mxu1 %vm201_vm2, %v4672_v44 }
 0x1eb   :  { %4192 = vmatprep.mubr.msk.f32.mxu1 %vm4555_vm1, %v4554_v43 }
 0x2a6   :  { %v272_v4 = vpop.f32.mrf.mxu1 }
 0x2a7   :  { %v353_v5 = vmul.f32 0.17677669, %v272_v4 }
 0x2a8   :  { %v4179_v6 = vpop.f32.mrf.mxu1 }
 0x2a9   :  { %v355_v7 = vadd.f32 %v353_v5, %v4704_v3 }
 0x2aa   :  { %v349_v13 = vpop.f32.mrf.mxu1 }
 0x2ab   :  { %v354_v14 = vmul.f32 0.17677669, %v349_v13  ;;  %v357_v15 = vsel %vm201_vm2, %v355_v7, -inf }
 0x2ac   :  { %358 = vmax.xlane.f32.xlu1 %v357_v15  ;;  %v4184_v16 = vpop.f32.mrf.mxu1 }
 0x2ad   :  { %v356_v17 = vadd.f32 %v354_v14, %v4708_v12 }
 0x2af   :  { %v360_v18 = vsel %vm201_vm2, %v356_v17, -inf }
 0x2b0   :  { %361 = vmax.xlane.f32.xlu0 %v360_v18 }
 0x2bd   :  { %455 = vrot.lane.b32.xlu1 %v4672_v44, %s4559_s6 }
 0x2c1   :  { %533 = vrot.lane.b32.xlu1 %v4676_v45, %s4560_s7 }
 0x2c5   :  { %611 = vrot.lane.b32.xlu1 %v4672_v44, %s4560_s7 }
 0x335   :  { %v359_v19 = vpop.xlane.xlu1 %358 }
 0x336   :  { %v363_v20 = vsub.f32 %v355_v7, %v359_v19 }
 0x338   :  { %v365_v21 = vmul.f32 1.442695, %v363_v20 }
 0x339   :  { %v456_v22 = vpop.permute.xlu1 %455  ;;  %v362_v23 = vpop.xlane.xlu0 %361 }
 0x33a   :  { %4458 = vpow2.f32 %v365_v21  ;;  %v364_v24 = vsub.f32 %v356_v17, %v362_v23  ;;  %4191 = vmatpush3.msra.mxu1 %v456_v22 }
 0x33b   :  { %4200 = vmatprep.subr.mxu1 %v4554_v43 }
 0x33c   :  { %v367_v25 = vmul.f32 1.442695, %v364_v24 }
 0x33d   :  { %v534_v34 = vpop.permute.xlu1 %533 }
 0x33e   :  { %4460 = vpow2.f32 %v367_v25 }
 0x341   :  { %v612_v35 = vpop.permute.xlu1 %611 }
 0x347   :  { %v4459_v26 = vpop.eup %4458 }
 0x348   :  { %v369_v31 = vsel %vm201_vm2, %v4459_v26, 0.0 }
 0x349   :  { %370 = vadd.xlane.f32.xlu0 %v369_v31 }
 0x34b   :  { %v4461_v32 = vpop.eup %4460 }
 0x34c   :  { %v372_v33 = vsel %vm201_vm2, %v4461_v32, 0.0 }
 0x34d   :  { %373 = vadd.xlane.f32.xlu1 %v372_v33 }
 0x35e   :  { %609 = vrot.lane.b32.xlu1 %v4672_v44, %s4561_s8 }
 0x35f   :  { %379 = vrot.lane.b32.xlu0 %v4676_v45, %s4559_s6 }
 0x363   :  { %531 = vrot.lane.b32.xlu0 %v4676_v45, %s4561_s8 }
 0x3d2   :  { %v371_v36 = vpop.xlane.xlu0 %370 }
 0x3d3   :  { %4462 = vrcp.f32 %v371_v36 }
 0x3d6   :  { %v374_v37 = vpop.xlane.xlu1 %373  ;;  %v380_v38 = vpop.permute.xlu0 %379 }
 0x3d7   :  { %4464 = vrcp.f32 %v374_v37  ;;  %4186 = vmatpush3.msra.mxu0 %v380_v38 }
 0x3d8   :  { %4195 = vmatprep.subr.mxu0 %v4554_v43 }
 0x3da   :  { %v532_v46 = vpop.permute.xlu0 %531  ;;  %v610_v47 = vpop.permute.xlu1 %609 }
 0x3e0   :  { %v4463_v39 = vpop.eup %4462 }
 0x3e1   :  { %v377_v40 = vmul.f32 %v4463_v39, %v4459_v26 }
 0x3e3   :  { %4188 = vmatmul.mubr.msk.f32.vlgmr.msra.gmra.mxu0 %vm201_vm2, %v377_v40 }
 0x3e4   :  { %v4465_v41 = vpop.eup %4464  ;;  %4196 = vmatpush3.xpose.msk.msra.mxu0 %vm201_vm2, %v534_v34  ;;  %4197 = vmatprep.mubr.msk.f32.mxu0 %vm4555_vm1, %v4554_v43 }
 0x3e5   :  { %v378_v42 = vmul.f32 %v4465_v41, %v4461_v32  ;;  %4205 = vmatprep.subr.mxu0 %v4554_v43 }
 0x3e7   :  { %4193 = vmatmul.mubr.msk.f32.vlgmr.msra.gmra.mxu1 %vm201_vm2, %v378_v42  ;;  %4198 = vmatmul.mubr.msk.f32.vlgmr.msra.gmra.mxu0 %vm201_vm2, %v532_v46 }
 0x3e8   :  { %4201 = vmatpush3.xpose.msk.msra.mxu1 %vm201_vm2, %v612_v35  ;;  %4202 = vmatprep.mubr.msk.f32.mxu1 %vm4555_vm1, %v4554_v43 }
 0x3e9   :  { %4210 = vmatprep.subr.mxu1 %v4554_v43  ;;  %4207 = vmatprep.mubr.msk.f32.mxu0 %vm4555_vm1, %v4554_v43 }
 0x3eb   :  { %4203 = vmatmul.mubr.msk.f32.vlgmr.msra.gmra.mxu1 %vm201_vm2, %v610_v47 }
 0x3ec   :  { %4212 = vmatprep.mubr.msk.f32.mxu1 %vm4555_vm1, %v4554_v43 }
 0x4a3   :  { %v4745_v48 = vpop.f32.mrf.mxu0 }
 0x4a5   :  { %v4189_v49 = vpop.f32.mrf.mxu0 }
 0x4a7   :  { %v4747_v50 = vpop.f32.mrf.mxu1  ;;  %v605_v51 = vpop.f32.mrf.mxu0 }
 0x4a8   :  { %v687_v52 = vmul.f32 0.17677669, %v605_v51 }
 0x4a9   :  { %v4194_v53 = vpop.f32.mrf.mxu1  ;;  %v4199_v54 = vpop.f32.mrf.mxu0 }
 0x4aa   :  { %v689_v55 = vadd.f32 %v687_v52, %v4704_v3 }
 0x4ab   :  { %v683_v56 = vpop.f32.mrf.mxu1 }
 0x4ac   :  { %v688_v57 = vmul.f32 0.17677669, %v683_v56  ;;  %v691_v58 = vsel %vm201_vm2, %v689_v55, -inf }
 0x4ad   :  { %692 = vmax.xlane.f32.xlu0 %v691_v58  ;;  %v4204_v59 = vpop.f32.mrf.mxu1 }
 0x4ae   :  { %v690_v60 = vadd.f32 %v688_v57, %v4708_v12 }
 0x4b0   :  { %v694_v61 = vsel %vm201_vm2, %v690_v60, -inf }
 0x4b1   :  { %695 = vmax.xlane.f32.xlu1 %v694_v61 }
 0x4c2   :  { %789 = vrot.lane.b32.xlu1 %v4672_v44, %s4562_s9 }
 0x4c6   :  { %866 = vrot.lane.b32.xlu1 %v4633_v10, %s4563_s10 }
 0x4ca   :  { %951 = vrot.lane.b32.xlu1 %v4642_v11, %s4563_s10 }
 0x4ce   :  { %1115 = vrot.lane.b32.xlu1 %v4672_v44, %s4564_s11 }
 0x4d2   :  { %1113 = vrot.lane.b32.xlu1 %v4672_v44, %s4565_s12 }
 0x536   :  { %v693_v63 = vpop.xlane.xlu0 %692 }
 0x537   :  { %v697_v4 = vsub.f32 %v689_v55, %v693_v63 }
 0x539   :  { %v699_v5 = vmul.f32 1.442695, %v697_v4 }
 0x53a   :  { %v696_v6 = vpop.xlane.xlu1 %695 }
 0x53b   :  { %4466 = vpow2.f32 %v699_v5  ;;  %v698_v7 = vsub.f32 %v690_v60, %v696_v6 }
 0x53d   :  { %v701_v13 = vmul.f32 1.442695, %v698_v7 }
 0x53e   :  { %v790_v14 = vpop.permute.xlu1 %789 }
 0x53f   :  { %4468 = vpow2.f32 %v701_v13  ;;  %4211 = vmatpush3.msra.mxu1 %v790_v14 }
 0x542   :  { %v867_v10 = vpop.permute.xlu1 %866 }
 0x546   :  { %v952_v11 = vpop.permute.xlu1 %951 }
 0x547   :  { %4220 = vmatprep.subr.mxu1 %v952_v11 }
 0x548   :  { %v4467_v15 = vpop.eup %4466 }
 0x549   :  { %v703_v16 = vsel %vm201_vm2, %v4467_v15, 0.0 }
 0x54a   :  { %704 = vadd.xlane.f32.xlu0 %v703_v16  ;;  %v1116_v26 = vpop.permute.xlu1 %1115 }
 0x54c   :  { %v4469_v17 = vpop.eup %4468 }
 0x54d   :  { %v706_v18 = vsel %vm201_vm2, %v4469_v17, 0.0 }
 0x54e   :  { %707 = vadd.xlane.f32.xlu0 %v706_v18  ;;  %v1114_v31 = vpop.permute.xlu1 %1113 }
 0x564   :  { %713 = vrot.lane.b32.xlu0 %v4676_v45, %s4562_s9 }
 0x568   :  { %1037 = vrot.lane.b32.xlu0 %v4676_v45, %s4564_s11 }
 0x56c   :  { %1035 = vrot.lane.b32.xlu0 %v4676_v45, %s4565_s12 }
 0x5d3   :  { %v705_v19 = vpop.xlane.xlu0 %704 }
 0x5d4   :  { %4470 = vrcp.f32 %v705_v19 }
 0x5d7   :  { %v708_v20 = vpop.xlane.xlu0 %707 }
 0x5d8   :  { %4472 = vrcp.f32 %v708_v20 }
 0x5db   :  { %v714_v21 = vpop.permute.xlu0 %713 }
 0x5dc   :  { %4206 = vmatpush3.msra.mxu0 %v714_v21 }
 0x5dd   :  { %4215 = vmatprep.subr.mxu0 %v867_v10 }
 0x5df   :  { %v1038_v33 = vpop.permute.xlu0 %1037 }
 0x5e1   :  { %v4471_v22 = vpop.eup %4470 }
 0x5e2   :  { %v711_v23 = vmul.f32 %v4471_v22, %v4467_v15 }
 0x5e3   :  { %v1036_v37 = vpop.permute.xlu0 %1035 }
 0x5e4   :  { %4208 = vmatmul.mubr.msk.f32.vlgmr.msra.gmra.mxu0 %vm201_vm2, %v711_v23 }
 0x5e5   :  { %v4473_v24 = vpop.eup %4472  ;;  %4216 = vmatpush3.msra.mxu0 %v867_v10 }
 0x5e6   :  { %v712_v25 = vmul.f32 %v4473_v24, %v4469_v17  ;;  %4225 = vmatprep.subr.mxu0 %v4554_v43 }
 0x5e8   :  { %4213 = vmatmul.mubr.msk.f32.vlgmr.msra.gmra.mxu1 %vm201_vm2, %v712_v25 }
 0x5e9   :  { %4222 = vmatprep.mubr.msk.f32.mxu1 %vm201_vm2, %v4745_v48  ;;  %4221 = vmatpush3.msra.mxu1 %v952_v11 }
 0x5ea   :  { %4230 = vmatprep.subr.mxu1 %v4554_v43 }
 0x5ec   :  { %4223 = vmatmul.mubr.msk.f32.vlgmr.msra.gmra.mxu1 %vm201_vm2, %v4747_v50 }
 0x5ed   :  { %4231 = vmatpush3.xpose.msk.msra.mxu1 %vm201_vm2, %v1116_v26  ;;  %4232 = vmatprep.mubr.msk.f32.mxu1 %vm4555_vm1, %v4554_v43 }
 0x5ee   :  { %4240 = vmatprep.subr.mxu1 %v4554_v43 }
 0x5f0   :  { %4233 = vmatmul.mubr.msk.f32.vlgmr.msra.gmra.mxu1 %vm201_vm2, %v1114_v31 }
 0x5f1   :  { %4242 = vmatprep.mubr.msk.f32.mxu1 %vm4555_vm1, %v4554_v43 }
 0x6a4   :  { %v785_v32 = vpop.f32.mrf.mxu0 }
 0x6a5   :  { %4217 = vmatprep.mubr.msk.f32.mxu0 %vm201_vm2, %v785_v32 }
 0x6a6   :  { %v4209_v34 = vpop.f32.mrf.mxu0 }
 0x6a8   :  { %v861_v35 = vpop.f32.mrf.mxu1 }
 0x6a9   :  { %4218 = vmatmul.mubr.msk.f32.vlgmr.msra.gmra.mxu0 %vm201_vm2, %v861_v35 }
 0x6aa   :  { %4226 = vmatpush3.xpose.msk.msra.mxu0 %vm201_vm2, %v1038_v33  ;;  %v4214_v36 = vpop.f32.mrf.mxu1  ;;  %4227 = vmatprep.mubr.msk.f32.mxu0 %vm4555_vm1, %v4554_v43 }
 0x6ab   :  { %4235 = vmatprep.subr.mxu0 %v4554_v43 }
 0x6ac   :  { %v4792_v38 = vpop.f32.mrf.mxu1 }
 0x6ad   :  { %4228 = vmatmul.mubr.msk.f32.vlgmr.msra.gmra.mxu0 %vm201_vm2, %v1036_v37 }
 0x6ae   :  { %v4795_v39 = vpop.f32.mrf.mxu1  ;;  %4237 = vmatprep.mubr.msk.f32.mxu0 %vm4555_vm1, %v4554_v43 }
 0x6b0   :  { %v1187_v40 = vpop.f32.mrf.mxu1 }
 0x6b1   :  { %v1192_v41 = vmul.f32 0.17677669, %v1187_v40 }
 0x6b2   :  { %v4234_v42 = vpop.f32.mrf.mxu1 }
 0x6b3   :  { %v1194_v46 = vadd.f32 %v1192_v41, %v4708_v12 }
 0x6b5   :  { %v1198_v47 = vsel %vm201_vm2, %v1194_v46, -inf }
 0x6b6   :  { %1199 = vmax.xlane.f32.xlu1 %v1198_v47 }
 0x6c7   :  { %1293 = vrot.lane.b32.xlu1 %v4672_v44, %s4566_s13 }
 0x6cb   :  { %1370 = vrot.lane.b32.xlu1 %v4626_v9, %s4563_s10 }
 0x6cf   :  { %1458 = vrot.lane.b32.xlu1 %v4676_v45, %s4567_s14 }
 0x6d3   :  { %1456 = vrot.lane.b32.xlu1 %v4676_v45, %s4568_s15 }
 0x73f   :  { %v1200_v48 = vpop.xlane.xlu1 %1199 }
 0x740   :  { %v1202_v50 = vsub.f32 %v1194_v46, %v1200_v48 }
 0x742   :  { %v1205_v51 = vmul.f32 1.442695, %v1202_v50 }
 0x743   :  { %v1294_v49 = vpop.permute.xlu1 %1293 }
 0x744   :  { %4241 = vmatpush3.msra.mxu1 %v1294_v49  ;;  %4474 = vpow2.f32 %v1205_v51 }
 0x745   :  { %4250 = vmatprep.subr.mxu1 %v4554_v43 }
 0x747   :  { %v1371_v5 = vpop.permute.xlu1 %1370 }
 0x74b   :  { %v1459_v13 = vpop.permute.xlu1 %1458 }
 0x74f   :  { %v1457_v11 = vpop.permute.xlu1 %1456 }
 0x751   :  { %v4475_v58 = vpop.eup %4474 }
 0x752   :  { %v1210_v59 = vsel %vm201_vm2, %v4475_v58, 0.0 }
 0x769   :  { %v4810_v52 = vpop.f32.mrf.mxu0 }
 0x76a   :  { %v1032_v35 = vadd.f32 %v4792_v38, %v4810_v52 }
 0x76b   :  { %v4812_v53 = vpop.f32.mrf.mxu0 }
 0x76c   :  { %v1027_v37 = vadd.f32 %v4795_v39, %v4812_v53 }
 0x76d   :  { %v1109_v9 = vpop.f32.mrf.mxu0 }
 0x76e   :  { %v1191_v54 = vmul.f32 0.17677669, %v1109_v9 }
 0x76f   :  { %v4229_v55 = vpop.f32.mrf.mxu0 }
 0x770   :  { %v1193_v56 = vadd.f32 %v1191_v54, %v4704_v3 }
 0x772   :  { %v1195_v57 = vsel %vm201_vm2, %v1193_v56, -inf }
 0x773   :  { %1196 = vmax.xlane.f32.xlu0 %v1195_v57 }
 0x777   :  { %1211 = vadd.xlane.f32.xlu0 %v1210_v59 }
 0x7fc   :  { %v1197_v60 = vpop.xlane.xlu0 %1196 }
 0x7fd   :  { %v1201_v61 = vsub.f32 %v1193_v56, %v1197_v60 }
 0x7ff   :  { %v1203_v63 = vmul.f32 1.442695, %v1201_v61 }
 0x800   :  { %v1212_v4 = vpop.xlane.xlu0 %1211 }
 0x801   :  { %4476 = vpow2.f32 %v1203_v63 }
 0x802   :  { %4478 = vrcp.f32 %v1212_v4 }
 0x80e   :  { %v4477_v6 = vpop.eup %4476 }
 0x80f   :  { %v4479_v7 = vpop.eup %4478  ;;  %v1207_v14 = vsel %vm201_vm2, %v4477_v6, 0.0 }
 0x810   :  { %1208 = vadd.xlane.f32.xlu0 %v1207_v14  ;;  %v1216_v10 = vmul.f32 %v4479_v7, %v4475_v58 }
 0x812   :  { %4243 = vmatmul.mubr.msk.f32.vlgmr.msra.gmra.mxu1 %vm201_vm2, %v1216_v10 }
 0x813   :  { %4251 = vmatpush3.xpose.msk.msra.mxu1 %vm201_vm2, %v1459_v13  ;;  %4252 = vmatprep.mubr.msk.f32.mxu1 %vm4555_vm1, %v4554_v43 }
 0x814   :  { %4260 = vmatprep.subr.mxu1 %v4554_v43 }
 0x816   :  { %4253 = vmatmul.mubr.msk.f32.vlgmr.msra.gmra.mxu1 %vm201_vm2, %v1457_v11 }
 0x817   :  { %4262 = vmatprep.mubr.msk.f32.mxu1 %vm4555_vm1, %v4554_v43 }
 0x826   :  { %1217 = vrot.lane.b32.xlu0 %v4676_v45, %s4566_s13 }
 0x82a   :  { %1536 = vrot.lane.b32.xlu0 %v4672_v44, %s4567_s14 }
 0x82e   :  { %1534 = vrot.lane.b32.xlu0 %v4672_v44, %s4568_s15 }
 0x899   :  { %v1209_v15 = vpop.xlane.xlu0 %1208 }
 0x89a   :  { %4480 = vrcp.f32 %v1209_v15 }
 0x89d   :  { %v1218_v16 = vpop.permute.xlu0 %1217 }
 0x89e   :  { %4236 = vmatpush3.msra.mxu0 %v1218_v16 }
 0x89f   :  { %4245 = vmatprep.subr.mxu0 %v1371_v5 }
 0x8a1   :  { %v1537_v31 = vpop.permute.xlu0 %1536 }
 0x8a7   :  { %v4481_v17 = vpop.eup %4480 }
 0x8a8   :  { %v1215_v18 = vmul.f32 %v4481_v17, %v4477_v6  ;;  %v1879_v6 = vsub.s32 6, %v4646_v27 }
 0x8aa   :  { %4238 = vmatmul.mubr.msk.f32.vlgmr.msra.gmra.mxu0 %vm201_vm2, %v1215_v18  ;;  %v1880_v7 = vrot.slane %v4654_v29, %v1879_v6 }
 0x8ab   :  { %4246 = vmatpush3.msra.mxu0 %v1371_v5 }
 0x8ac   :  { %4255 = vmatprep.subr.mxu0 %v4554_v43 }
 0x8d2   :  { %v1365_v19 = vpop.f32.mrf.mxu1 }
 0x8d4   :  { %v4244_v20 = vpop.f32.mrf.mxu1 }
 0x8d6   :  { %v1530_v21 = vpop.f32.mrf.mxu1 }
 0x8d7   :  { %v1612_v22 = vmul.f32 0.17677669, %v1530_v21 }
 0x8d8   :  { %v4254_v23 = vpop.f32.mrf.mxu1 }
 0x8d9   :  { %v1614_v24 = vadd.f32 %v1612_v22, %v4704_v3  ;;  %v4887_v23 = vld [vmem:[%s5209_s2 + $0x50] sm:$0xff] }
 0x8db   :  { %v1616_v25 = vsel %vm201_vm2, %v1614_v24, -inf }
 0x8dc   :  { %1617 = vmax.xlane.f32.xlu1 %v1616_v25  ;;  %v4899_v25 = vld [vmem:[%s5209_s2 + $0x20] sm:$0xff] }
 0x8ed   :  { %1638 = vrot.lane.b32.xlu1 %v4676_v45, %s4569_s16  ;;  %v1535_v45 = vpop.permute.xlu0 %1534 }
 0x8f1   :  { %1791 = vrot.lane.b32.xlu1 %v4621_v8, %s4563_s10 }
 0x965   :  { %v1618_v26 = vpop.xlane.xlu1 %1617 }
 0x966   :  { %v1622_v8 = vsub.f32 %v1614_v24, %v1618_v26  ;;  %v4892_v24 = vld [vmem:[%s5209_s2 + $0x38] sm:$0xff]  ;;  %v4906_v26 = vld [vmem:[%s5209_s2 + $0x8] sm:$0xff] }
 0x968   :  { %v1624_v3 = vmul.f32 1.442695, %v1622_v8 }
 0x969   :  { %v1639_v32 = vpop.permute.xlu1 %1638 }
 0x96a   :  { %4261 = vmatpush3.msra.mxu1 %v1639_v32  ;;  %v1289_v33 = vpop.f32.mrf.mxu0  ;;  %4482 = vpow2.f32 %v1624_v3 }
 0x96b   :  { %4247 = vmatprep.mubr.msk.f32.mxu0 %vm201_vm2, %v1289_v33 }
 0x96c   :  { %v4239_v34 = vpop.f32.mrf.mxu0  ;;  %4248 = vmatmul.mubr.msk.f32.vlgmr.msra.gmra.mxu0 %vm201_vm2, %v1365_v19 }
 0x96d   :  { %4256 = vmatpush3.xpose.msk.msra.mxu0 %vm201_vm2, %v1537_v31  ;;  %4257 = vmatprep.mubr.msk.f32.mxu0 %vm4555_vm1, %v4554_v43 }
 0x96e   :  { %4265 = vmatprep.subr.mxu0 %v4554_v43 }
 0x970   :  { %4258 = vmatmul.mubr.msk.f32.vlgmr.msra.gmra.mxu0 %vm201_vm2, %v1535_v45 }
 0x971   :  { %4267 = vmatprep.mubr.msk.f32.mxu0 %vm4555_vm1, %v4554_v43 }
 0x977   :  { %v4483_v51 = vpop.eup %4482 }
 0x978   :  { %v1628_v9 = vsel %vm201_vm2, %v4483_v51, 0.0 }
 0xa2c   :  { %v4249_v36 = vpop.f32.mrf.mxu0 }
 0xa2d   :  { %v1455_v40 = vadd.f32 %v4249_v36, %v1032_v35 }
 0xa2e   :  { %v1445_v41 = vpop.f32.mrf.mxu0 }
 0xa2f   :  { %v1454_v42 = vadd.f32 %v1445_v41, %v1027_v37 }
 0xa30   :  { %v1608_v46 = vpop.f32.mrf.mxu0 }
 0xa31   :  { %v1613_v47 = vmul.f32 0.17677669, %v1608_v46 }
 0xa32   :  { %v4259_v48 = vpop.f32.mrf.mxu0 }
 0xa33   :  { %v1615_v49 = vadd.f32 %v1613_v47, %v4708_v12  ;;  %v1792_v12 = vpop.permute.xlu1 %1791  ;;  %v1917_v47 = vsub.s32 2, %v4646_v27  ;;  %v1923_v48 = vsub.s32 3, %v4646_v27 }
 0xa34   :  { %4270 = vmatprep.subr.mxu1 %v1792_v12 }
 0xa35   :  { %v1619_v50 = vsel %vm201_vm2, %v1615_v49, -inf }
 0xa36   :  { %1620 = vmax.xlane.f32.xlu0 %v1619_v50  ;;  %v1918_v50 = vrot.slane %v4654_v29, %v1917_v47 }
 0xa3a   :  { %1629 = vadd.xlane.f32.xlu0 %v1628_v9 }
 0xabf   :  { %v1621_v38 = vpop.xlane.xlu0 %1620 }
 0xac0   :  { %v1623_v52 = vsub.f32 %v1615_v49, %v1621_v38 }
 0xac2   :  { %v1626_v54 = vmul.f32 1.442695, %v1623_v52  ;;  %v1924_v52 = vrot.slane %v4654_v29, %v1923_v48  ;;  %v23_v29 = vld [vmem:[%s5207_s0 + $0x18] sm:$0xff] }
 0xac3   :  { %v1630_v55 = vpop.xlane.xlu0 %1629 }
 0xac4   :  { %4484 = vpow2.f32 %v1626_v54 }
 0xac5   :  { %4486 = vrcp.f32 %v1630_v55 }
 0xad1   :  { %v4485_v39 = vpop.eup %4484 }
 0xad2   :  { %v4487_v53 = vpop.eup %4486  ;;  %v1631_v56 = vsel %vm201_vm2, %v4485_v39, 0.0 }
 0xad3   :  { %1632 = vadd.xlane.f32.xlu0 %v1631_v56  ;;  %v1636_v57 = vmul.f32 %v4487_v53, %v4483_v51 }
 0xad5   :  { %4263 = vmatmul.mubr.msk.f32.vlgmr.msra.gmra.mxu1 %vm201_vm2, %v1636_v57 }
 0xad6   :  { %4271 = vmatpush3.msra.mxu1 %v1792_v12  ;;  %v22_v12 = vld [vmem:[%s5207_s0 + $0x10] sm:$0xff] }
 0xad7   :  { %4275 = vmatprep.subr.mxu1 %v4887_v23 }
 0xae9   :  { %1714 = vrot.lane.b32.xlu0 %v4672_v44, %s4569_s16 }
 0xb5c   :  { %v1633_v58 = vpop.xlane.xlu0 %1632 }
 0xb5d   :  { %4488 = vrcp.f32 %v1633_v58 }
 0xb60   :  { %v1715_v59 = vpop.permute.xlu0 %1714 }
 0xb61   :  { %4266 = vmatpush3.msra.mxu0 %v1715_v59 }
 0xb62   :  { %4304 = vmatprep.subr.mxu0 %v4554_v43 }
 0xb6a   :  { %v4489_v60 = vpop.eup %4488 }
 0xb6b   :  { %v1637_v61 = vmul.f32 %v4489_v60, %v4485_v39 }
 0xb6d   :  { %4268 = vmatmul.mubr.msk.f32.vlgmr.msra.gmra.mxu0 %vm201_vm2, %v1637_v61 }
 0xb6e   :  { %4306 = vmatprep.mubr.msk.f32.mxu0 %vm4555_vm1, %v4554_v43 }
 0xb95   :  { %v1710_v63 = vpop.f32.mrf.mxu1 }
 0xb96   :  { %4272 = vmatprep.mubr.msk.f32.mxu1 %vm201_vm2, %v1710_v63 }
 0xb97   :  { %v4264_v44 = vpop.f32.mrf.mxu1 }
 0xc2d   :  { %v1786_v4 = vpop.f32.mrf.mxu0 }
 0xc2e   :  { %4273 = vmatmul.mubr.msk.f32.vlgmr.msra.gmra.mxu1 %vm201_vm2, %v1786_v4 }
 0xc2f   :  { %v4269_v5 = vpop.f32.mrf.mxu0  ;;  %4276 = vmatpush3.msra.mxu1 %v4887_v23 }
 0xc30   :  { %4277 = vmatprep.subr.mxu1 %v4892_v24 }
 0xc31   :  { %4278 = vmatpush3.msra.mxu1 %v4892_v24 }
 0xc32   :  { %4279 = vmatprep.subr.mxu1 %v4899_v25 }
 0xc33   :  { %4280 = vmatpush3.msra.mxu1 %v4899_v25 }
 0xc34   :  { %4281 = vmatprep.subr.mxu1 %v4906_v26 }
 0xc35   :  { %4282 = vmatpush3.msra.mxu1 %v4906_v26 }
 0xc36   :  { %4289 = vmatprep.subr.mxu1 %v4554_v43 }
 0xcee   :  { %v4274_v13 = vpop.f32.mrf.mxu1 }
 0xcef   :  { %v1876_v14 = vadd.f32 %v4274_v13, %v1455_v40 }
 0xcf0   :  { %v1866_v10 = vpop.f32.mrf.mxu1 }
 0xcf1   :  { %v1882_v11 = vadd.f32 %v1880_v7, %v1876_v14  ;;  %v1875_v15 = vadd.f32 %v1866_v10, %v1454_v42 }
 0xcf3   :  { %v4869_v16 = vadd.f32 %v1882_v11, %v4606_v1  ;;  %v1881_v17 = vadd.f32 %v1880_v7, %v1875_v15 }
 0xcf5   :  { %v4872_v18 = vadd.f32 %v1881_v17, %v4601_v0  ;;  %v1888_v19 = vsel %vm69_vm0, %v4869_v16, 0.0  ;;  %v1894_v22 = vmul.f32 %v4869_v16, %v4869_v16 }
 0xcf6   :  { %1889 = vadd.xlane.f32.xlu0 %v1888_v19 }
 0xcf7   :  { %v1885_v20 = vsel %vm69_vm0, %v4872_v18, 0.0  ;;  %v1893_v21 = vmul.f32 %v4872_v18, %v4872_v18  ;;  %v1898_v0 = vsel %vm69_vm0, %v1894_v22, 0.0 }
 0xcf8   :  { %1886 = vadd.xlane.f32.xlu1 %v1885_v20 }
 0xcf9   :  { %v1895_v1 = vsel %vm69_vm0, %v1893_v21, 0.0 }
 0xcfa   :  { %1896 = vadd.xlane.f32.xlu0 %v1895_v1 }
 0xcfc   :  { %1899 = vadd.xlane.f32.xlu1 %v1898_v0 }
 0xd7f   :  { %v1890_v31 = vpop.xlane.xlu0 %1889 }
 0xd80   :  { %v1892_v33 = vmul.f32 0.03125, %v1890_v31 }
 0xd81   :  { %v1887_v32 = vpop.xlane.xlu1 %1886 }
 0xd82   :  { %v1891_v34 = vmul.f32 0.03125, %v1887_v32  ;;  %v1904_v36 = vmul.f32 %v1892_v33, %v1892_v33  ;;  %v1908_v9 = vsub.f32 %v4869_v16, %v1892_v33 }
 0xd83   :  { %v1897_v45 = vpop.xlane.xlu0 %1896 }
 0xd84   :  { %v1903_v8 = vmul.f32 %v1891_v34, %v1891_v34  ;;  %v1901_v3 = vmul.f32 0.03125, %v1897_v45  ;;  %v1907_v49 = vsub.f32 %v4872_v18, %v1891_v34 }
 0xd85   :  { %v1900_v35 = vpop.xlane.xlu1 %1899 }
 0xd86   :  { %v1905_v37 = vsub.f32 %v1901_v3, %v1903_v8  ;;  %v1902_v40 = vmul.f32 0.03125, %v1900_v35 }
 0xd88   :  { %v1909_v41 = vadd.f32 1e-05, %v1905_v37  ;;  %v1906_v42 = vsub.f32 %v1902_v40, %v1904_v36 }
 0xd8a   :  { %4490 = vrsqrt.f32 %v1909_v41  ;;  %v1910_v46 = vadd.f32 1e-05, %v1906_v42 }
 0xd8c   :  { %4492 = vrsqrt.f32 %v1910_v46 }
 0xd97   :  { %v4491_v51 = vpop.eup %4490 }
 0xd98   :  { %v1913_v38 = vmul.f32 %v4491_v51, %v1907_v49 }
 0xd99   :  { %v4493_v54 = vpop.eup %4492 }
 0xd9a   :  { %v1914_v55 = vmul.f32 %v4493_v54, %v1908_v9  ;;  %v1919_v39 = vmul.f32 %v1918_v50, %v1913_v38 }
 0xd9c   :  { %v1920_v53 = vmul.f32 %v1918_v50, %v1914_v55  ;;  %v1925_v56 = vadd.f32 %v1924_v52, %v1919_v39 }
 0xd9e   :  { %v1926_v57 = vadd.f32 %v1924_v52, %v1920_v53  ;;  %4283 = vmatprep.mubr.msk.f32.mxu1 %vm69_vm0, %v1925_v56 }
 0xda0   :  { %4284 = vmatmul.mubr.msk.f32.vlgmr.msra.gmra.mxu1 %vm69_vm0, %v1926_v57 }
 0xda1   :  { %4286 = vmatprep.mubr.msk.f32.mxu1 %vm69_vm0, %v22_v12 }
 0xda4   :  { %4287 = vmatmul.mubr.msk.f32.gmra.mxu1 %vm69_vm0, %v23_v29 }
 0xda5   :  { %4291 = vmatprep.mubr.msk.f32.mxu1 %vm4555_vm1, %v4554_v43 }
 0xe60   :  { %v4931_v58 = vpop.f32.mrf.mxu1 }
 0xe62   :  { %v4933_v59 = vpop.f32.mrf.mxu1 }
 0xe64   :  { %v4935_v60 = vpop.f32.mrf.mxu1 }
 0xe65   :  { %2107 = vrot.lane.b32.xlu1 %v4935_v60, %s4556_s29 }
 0xe66   :  { %v4939_v61 = vpop.f32.mrf.mxu1 }
 0xe67   :  { %2029 = vrot.lane.b32.xlu0 %v4939_v61, %s4556_s29 }
 0xed7   :  { %v2108_v44 = vpop.permute.xlu1 %2107 }
 0xed9   :  { %v2030_v63 = vpop.permute.xlu0 %2029 }
 0xeda   :  { %4290 = vmatpush3.xpose.msk.msra.mxu1 %vm201_vm2, %v2030_v63 }
 0xedb   :  { %4294 = vmatprep.subr.mxu1 %v4554_v43 }
 0xedd   :  { %4292 = vmatmul.mubr.msk.f32.vlgmr.msra.gmra.mxu1 %vm201_vm2, %v4933_v59 }
 0xede   :  { %4295 = vmatpush3.xpose.msk.msra.mxu1 %vm201_vm2, %v2108_v44  ;;  %4296 = vmatprep.mubr.msk.f32.mxu1 %vm4555_vm1, %v4554_v43 }
 0xedf   :  { %4299 = vmatprep.subr.mxu1 %v4554_v43 }
 0xee1   :  { %4297 = vmatmul.mubr.msk.f32.vlgmr.msra.gmra.mxu1 %vm201_vm2, %v4931_v58 }
 0xee2   :  { %4301 = vmatprep.mubr.msk.f32.mxu1 %vm4555_vm1, %v4554_v43 }
 0xf9d   :  { %v2102_v4 = vpop.f32.mrf.mxu1 }
 0xf9e   :  { %v2184_v5 = vmul.f32 0.17677669, %v2102_v4 }
 0xf9f   :  { %v4293_v6 = vpop.f32.mrf.mxu1 }
 0xfa0   :  { %v2186_v7 = vadd.f32 %v2184_v5, %v4698_v62 }
 0xfa1   :  { %v2180_v13 = vpop.f32.mrf.mxu1 }
 0xfa2   :  { %v2185_v14 = vmul.f32 0.17677669, %v2180_v13  ;;  %v2188_v10 = vsel %vm201_vm2, %v2186_v7, -inf }
 0xfa3   :  { %2189 = vmax.xlane.f32.xlu1 %v2188_v10  ;;  %v4298_v11 = vpop.f32.mrf.mxu1 }
 0xfa4   :  { %v2187_v15 = vadd.f32 %v2185_v14, %v4701_v2 }
 0xfa6   :  { %v2191_v17 = vsel %vm201_vm2, %v2187_v15, -inf }
 0xfa7   :  { %2192 = vmax.xlane.f32.xlu0 %v2191_v17 }
 0xfb4   :  { %2286 = vrot.lane.b32.xlu1 %v4935_v60, %s4559_s6 }
 0xfb8   :  { %2364 = vrot.lane.b32.xlu1 %v4939_v61, %s4560_s7 }
 0xfbc   :  { %2442 = vrot.lane.b32.xlu1 %v4935_v60, %s4560_s7 }
0x102c   :  { %v2190_v19 = vpop.xlane.xlu1 %2189 }
0x102d   :  { %v2194_v20 = vsub.f32 %v2186_v7, %v2190_v19 }
0x102f   :  { %v2196_v21 = vmul.f32 1.442695, %v2194_v20 }
0x1030   :  { %v2287_v22 = vpop.permute.xlu1 %2286  ;;  %v2193_v1 = vpop.xlane.xlu0 %2192 }
0x1031   :  { %4494 = vpow2.f32 %v2196_v21  ;;  %v2195_v0 = vsub.f32 %v2187_v15, %v2193_v1  ;;  %4305 = vmatpush3.msra.mxu0 %v2287_v22 }
0x1032   :  { %4314 = vmatprep.subr.mxu0 %v4554_v43 }
0x1033   :  { %v2198_v31 = vmul.f32 1.442695, %v2195_v0 }
0x1034   :  { %v2365_v8 = vpop.permute.xlu1 %2364 }
0x1035   :  { %4496 = vpow2.f32 %v2198_v31 }
0x1038   :  { %v2443_v3 = vpop.permute.xlu1 %2442 }
0x103e   :  { %v4495_v32 = vpop.eup %4494 }
0x103f   :  { %v2200_v33 = vsel %vm201_vm2, %v4495_v32, 0.0 }
0x1040   :  { %2201 = vadd.xlane.f32.xlu0 %v2200_v33 }
0x1042   :  { %v4497_v34 = vpop.eup %4496 }
0x1043   :  { %v2203_v45 = vsel %vm201_vm2, %v4497_v34, 0.0 }
0x1044   :  { %2204 = vadd.xlane.f32.xlu1 %v2203_v45 }
0x1055   :  { %2440 = vrot.lane.b32.xlu1 %v4931_v58, %s4561_s8 }
0x1056   :  { %2210 = vrot.lane.b32.xlu0 %v4939_v61, %s4559_s6 }
0x105a   :  { %2362 = vrot.lane.b32.xlu0 %v4933_v59, %s4561_s8 }
0x10c9   :  { %v2202_v35 = vpop.xlane.xlu0 %2201 }
0x10ca   :  { %4498 = vrcp.f32 %v2202_v35 }
0x10cd   :  { %v2205_v36 = vpop.xlane.xlu1 %2204  ;;  %v2211_v37 = vpop.permute.xlu0 %2210 }
0x10ce   :  { %4500 = vrcp.f32 %v2205_v36  ;;  %4300 = vmatpush3.msra.mxu1 %v2211_v37 }
0x10cf   :  { %4309 = vmatprep.subr.mxu1 %v4554_v43 }
0x10d1   :  { %v2363_v47 = vpop.permute.xlu0 %2362  ;;  %v2441_v48 = vpop.permute.xlu1 %2440 }
0x10d7   :  { %v4499_v40 = vpop.eup %4498 }
0x10d8   :  { %v2208_v41 = vmul.f32 %v4499_v40, %v4495_v32 }
0x10da   :  { %4302 = vmatmul.mubr.msk.f32.vlgmr.msra.gmra.mxu1 %vm201_vm2, %v2208_v41 }
0x10db   :  { %v4501_v42 = vpop.eup %4500  ;;  %4310 = vmatpush3.xpose.msk.msra.mxu1 %vm201_vm2, %v2365_v8  ;;  %4311 = vmatprep.mubr.msk.f32.mxu1 %vm4555_vm1, %v4554_v43 }
0x10dc   :  { %v2209_v46 = vmul.f32 %v4501_v42, %v4497_v34  ;;  %4319 = vmatprep.subr.mxu1 %v4554_v43 }
0x10de   :  { %4307 = vmatmul.mubr.msk.f32.vlgmr.msra.gmra.mxu0 %vm201_vm2, %v2209_v46  ;;  %4312 = vmatmul.mubr.msk.f32.vlgmr.msra.gmra.mxu1 %vm201_vm2, %v2363_v47 }
0x10df   :  { %4315 = vmatpush3.xpose.msk.msra.mxu0 %vm201_vm2, %v2443_v3  ;;  %4316 = vmatprep.mubr.msk.f32.mxu0 %vm4555_vm1, %v4554_v43 }
0x10e0   :  { %4324 = vmatprep.subr.mxu0 %v4554_v43  ;;  %4321 = vmatprep.mubr.msk.f32.mxu1 %vm4555_vm1, %v4554_v43 }
0x10e2   :  { %4317 = vmatmul.mubr.msk.f32.vlgmr.msra.gmra.mxu0 %vm201_vm2, %v2441_v48 }
0x10e3   :  { %4326 = vmatprep.mubr.msk.f32.mxu0 %vm4555_vm1, %v4554_v43 }
0x119a   :  { %v2282_v49 = vpop.f32.mrf.mxu1 }
0x119c   :  { %v4303_v50 = vpop.f32.mrf.mxu1 }
0x119e   :  { %v2358_v51 = vpop.f32.mrf.mxu0  ;;  %v2436_v9 = vpop.f32.mrf.mxu1 }
0x119f   :  { %v2518_v38 = vmul.f32 0.17677669, %v2436_v9 }
0x11a0   :  { %v4308_v52 = vpop.f32.mrf.mxu0  ;;  %v4313_v54 = vpop.f32.mrf.mxu1 }
0x11a1   :  { %v2520_v55 = vadd.f32 %v2518_v38, %v4698_v62 }
0x11a2   :  { %v2514_v39 = vpop.f32.mrf.mxu0 }
0x11a3   :  { %v2519_v53 = vmul.f32 0.17677669, %v2514_v39  ;;  %v2522_v56 = vsel %vm201_vm2, %v2520_v55, -inf }
0x11a4   :  { %v4318_v57 = vpop.f32.mrf.mxu0  ;;  %2523 = vmax.xlane.f32.xlu0 %v2522_v56 }
0x11a5   :  { %v2521_v12 = vadd.f32 %v2519_v53, %v4701_v2 }
0x11a7   :  { %v2525_v29 = vsel %vm201_vm2, %v2521_v12, -inf }
0x11a8   :  { %2526 = vmax.xlane.f32.xlu1 %v2525_v29 }
0x11b9   :  { %2620 = vrot.lane.b32.xlu1 %v4935_v60, %s4562_s9 }
0x11bd   :  { %2697 = vrot.lane.b32.xlu1 %v4899_v25, %s4563_s10 }
0x11c1   :  { %2782 = vrot.lane.b32.xlu1 %v4906_v26, %s4563_s10 }
0x11c5   :  { %2946 = vrot.lane.b32.xlu1 %v4935_v60, %s4564_s11 }
0x11c9   :  { %2944 = vrot.lane.b32.xlu1 %v4931_v58, %s4565_s12 }
0x122d   :  { %v2524_v63 = vpop.xlane.xlu0 %2523 }
0x122e   :  { %v2528_v44 = vsub.f32 %v2520_v55, %v2524_v63 }
0x1230   :  { %v2530_v4 = vmul.f32 1.442695, %v2528_v44 }
0x1231   :  { %v2527_v5 = vpop.xlane.xlu1 %2526 }
0x1232   :  { %4502 = vpow2.f32 %v2530_v4  ;;  %v2529_v6 = vsub.f32 %v2521_v12, %v2527_v5 }
0x1234   :  { %v2532_v7 = vmul.f32 1.442695, %v2529_v6 }
0x1235   :  { %v2621_v13 = vpop.permute.xlu1 %2620 }
0x1236   :  { %4504 = vpow2.f32 %v2532_v7  ;;  %4325 = vmatpush3.msra.mxu0 %v2621_v13 }
0x1239   :  { %v2698_v25 = vpop.permute.xlu1 %2697 }
0x123d   :  { %v2783_v14 = vpop.permute.xlu1 %2782 }
0x123e   :  { %4334 = vmatprep.subr.mxu0 %v2783_v14 }
0x123f   :  { %v4503_v26 = vpop.eup %4502 }
0x1240   :  { %v2534_v10 = vsel %vm201_vm2, %v4503_v26, 0.0 }
0x1241   :  { %2535 = vadd.xlane.f32.xlu0 %v2534_v10  ;;  %v2947_v31 = vpop.permute.xlu1 %2946 }
0x1243   :  { %v4505_v11 = vpop.eup %4504 }
0x1244   :  { %v2537_v15 = vsel %vm201_vm2, %v4505_v11, 0.0 }
0x1245   :  { %2538 = vadd.xlane.f32.xlu0 %v2537_v15  ;;  %v2945_v32 = vpop.permute.xlu1 %2944 }
0x125b   :  { %2544 = vrot.lane.b32.xlu0 %v4939_v61, %s4562_s9 }
0x125f   :  { %2868 = vrot.lane.b32.xlu0 %v4939_v61, %s4564_s11 }
0x1263   :  { %2866 = vrot.lane.b32.xlu0 %v4933_v59, %s4565_s12 }
0x12ca   :  { %v2536_v17 = vpop.xlane.xlu0 %2535 }
0x12cb   :  { %4506 = vrcp.f32 %v2536_v17 }
0x12ce   :  { %v2539_v19 = vpop.xlane.xlu0 %2538 }
0x12cf   :  { %4508 = vrcp.f32 %v2539_v19 }
0x12d2   :  { %v2545_v20 = vpop.permute.xlu0 %2544 }
0x12d3   :  { %4320 = vmatpush3.msra.mxu1 %v2545_v20 }
0x12d4   :  { %4329 = vmatprep.subr.mxu1 %v2698_v25 }
0x12d6   :  { %v2869_v34 = vpop.permute.xlu0 %2868 }
0x12d8   :  { %v4507_v21 = vpop.eup %4506 }
0x12d9   :  { %v2542_v22 = vmul.f32 %v4507_v21, %v4503_v26 }
0x12da   :  { %v2867_v35 = vpop.permute.xlu0 %2866 }
0x12db   :  { %4322 = vmatmul.mubr.msk.f32.vlgmr.msra.gmra.mxu1 %vm201_vm2, %v2542_v22 }
0x12dc   :  { %v4509_v1 = vpop.eup %4508  ;;  %4330 = vmatpush3.msra.mxu1 %v2698_v25 }
0x12dd   :  { %v2543_v0 = vmul.f32 %v4509_v1, %v4505_v11  ;;  %4339 = vmatprep.subr.mxu1 %v4554_v43 }
0x12df   :  { %4327 = vmatmul.mubr.msk.f32.vlgmr.msra.gmra.mxu0 %vm201_vm2, %v2543_v0 }
0x12e0   :  { %4336 = vmatprep.mubr.msk.f32.mxu0 %vm201_vm2, %v2282_v49  ;;  %4335 = vmatpush3.msra.mxu0 %v2783_v14 }
0x12e1   :  { %4344 = vmatprep.subr.mxu0 %v4554_v43 }
0x12e3   :  { %4337 = vmatmul.mubr.msk.f32.vlgmr.msra.gmra.mxu0 %vm201_vm2, %v2358_v51 }
0x12e4   :  { %4345 = vmatpush3.xpose.msk.msra.mxu0 %vm201_vm2, %v2947_v31  ;;  %4346 = vmatprep.mubr.msk.f32.mxu0 %vm4555_vm1, %v4554_v43 }
0x12e5   :  { %4354 = vmatprep.subr.mxu0 %v4554_v43 }
0x12e7   :  { %4347 = vmatmul.mubr.msk.f32.vlgmr.msra.gmra.mxu0 %vm201_vm2, %v2945_v32 }
0x12e8   :  { %4356 = vmatprep.mubr.msk.f32.mxu0 %vm4555_vm1, %v4554_v43 }
0x139b   :  { %v2616_v33 = vpop.f32.mrf.mxu1 }
0x139c   :  { %4331 = vmatprep.mubr.msk.f32.mxu1 %vm201_vm2, %v2616_v33 }
0x139d   :  { %v4323_v45 = vpop.f32.mrf.mxu1 }
0x139f   :  { %v2692_v8 = vpop.f32.mrf.mxu0 }
0x13a0   :  { %4332 = vmatmul.mubr.msk.f32.vlgmr.msra.gmra.mxu1 %vm201_vm2, %v2692_v8 }
0x13a1   :  { %4340 = vmatpush3.xpose.msk.msra.mxu1 %vm201_vm2, %v2869_v34  ;;  %v4328_v3 = vpop.f32.mrf.mxu0  ;;  %4341 = vmatprep.mubr.msk.f32.mxu1 %vm4555_vm1, %v4554_v43 }
0x13a2   :  { %4349 = vmatprep.subr.mxu1 %v4554_v43 }
0x13a3   :  { %v5032_v36 = vpop.f32.mrf.mxu0 }
0x13a4   :  { %4342 = vmatmul.mubr.msk.f32.vlgmr.msra.gmra.mxu1 %vm201_vm2, %v2867_v35 }
0x13a5   :  { %v5035_v37 = vpop.f32.mrf.mxu0  ;;  %4351 = vmatprep.mubr.msk.f32.mxu1 %vm4555_vm1, %v4554_v43 }
0x13a7   :  { %v3018_v40 = vpop.f32.mrf.mxu0 }
0x13a8   :  { %v3023_v41 = vmul.f32 0.17677669, %v3018_v40 }
0x13a9   :  { %v4348_v42 = vpop.f32.mrf.mxu0 }
0x13aa   :  { %v3025_v46 = vadd.f32 %v3023_v41, %v4701_v2 }
0x13ac   :  { %v3029_v47 = vsel %vm201_vm2, %v3025_v46, -inf }
0x13ad   :  { %3030 = vmax.xlane.f32.xlu1 %v3029_v47 }
0x13be   :  { %3124 = vrot.lane.b32.xlu1 %v4935_v60, %s4566_s13 }
0x13c2   :  { %3201 = vrot.lane.b32.xlu1 %v4892_v24, %s4563_s10 }
0x13c6   :  { %3289 = vrot.lane.b32.xlu1 %v4939_v61, %s4567_s14 }
0x13ca   :  { %3287 = vrot.lane.b32.xlu1 %v4933_v59, %s4568_s15 }
0x1436   :  { %v3031_v48 = vpop.xlane.xlu1 %3030 }
0x1437   :  { %v3033_v50 = vsub.f32 %v3025_v46, %v3031_v48 }
0x1439   :  { %v3036_v51 = vmul.f32 1.442695, %v3033_v50 }
0x143a   :  { %v3125_v49 = vpop.permute.xlu1 %3124 }
0x143b   :  { %4355 = vmatpush3.msra.mxu0 %v3125_v49  ;;  %4510 = vpow2.f32 %v3036_v51 }
0x143c   :  { %4364 = vmatprep.subr.mxu0 %v4554_v43 }
0x143e   :  { %v3202_v63 = vpop.permute.xlu1 %3201 }
0x1442   :  { %v3290_v5 = vpop.permute.xlu1 %3289 }
0x1446   :  { %v3288_v13 = vpop.permute.xlu1 %3287 }
0x1448   :  { %v4511_v59 = vpop.eup %4510 }
0x1449   :  { %v3041_v53 = vsel %vm201_vm2, %v4511_v59, 0.0 }
0x1460   :  { %v5050_v9 = vpop.f32.mrf.mxu1 }
0x1461   :  { %v2863_v33 = vadd.f32 %v5032_v36, %v5050_v9 }
0x1462   :  { %v5052_v38 = vpop.f32.mrf.mxu1 }
0x1463   :  { %v2858_v45 = vadd.f32 %v5035_v37, %v5052_v38 }
0x1464   :  { %v2940_v52 = vpop.f32.mrf.mxu1 }
0x1465   :  { %v3022_v24 = vmul.f32 0.17677669, %v2940_v52 }
0x1466   :  { %v4343_v54 = vpop.f32.mrf.mxu1 }
0x1467   :  { %v3024_v55 = vadd.f32 %v3022_v24, %v4698_v62 }
0x1469   :  { %v3026_v39 = vsel %vm201_vm2, %v3024_v55, -inf }
0x146a   :  { %3027 = vmax.xlane.f32.xlu0 %v3026_v39 }
0x146e   :  { %3042 = vadd.xlane.f32.xlu0 %v3041_v53 }
0x14f3   :  { %v3028_v56 = vpop.xlane.xlu0 %3027 }
0x14f4   :  { %v3032_v57 = vsub.f32 %v3024_v55, %v3028_v56 }
0x14f6   :  { %v3034_v12 = vmul.f32 1.442695, %v3032_v57 }
0x14f7   :  { %v3043_v29 = vpop.xlane.xlu0 %3042 }
0x14f8   :  { %4512 = vpow2.f32 %v3034_v12  ;;  %v5107_v12 = vld [vmem:[%s5208_s1] sm:$0xff] }
0x14f9   :  { %4514 = vrcp.f32 %v3043_v29 }
0x1505   :  { %v4513_v44 = vpop.eup %4512 }
0x1506   :  { %v4515_v4 = vpop.eup %4514  ;;  %v3038_v6 = vsel %vm201_vm2, %v4513_v44, 0.0 }
0x1507   :  { %3039 = vadd.xlane.f32.xlu0 %v3038_v6  ;;  %v3047_v7 = vmul.f32 %v4515_v4, %v4511_v59 }
0x1509   :  { %4357 = vmatmul.mubr.msk.f32.vlgmr.msra.gmra.mxu0 %vm201_vm2, %v3047_v7 }
0x150a   :  { %4365 = vmatpush3.xpose.msk.msra.mxu0 %vm201_vm2, %v3290_v5  ;;  %4366 = vmatprep.mubr.msk.f32.mxu0 %vm4555_vm1, %v4554_v43 }
0x150b   :  { %4374 = vmatprep.subr.mxu0 %v4554_v43 }
0x150d   :  { %4367 = vmatmul.mubr.msk.f32.vlgmr.msra.gmra.mxu0 %vm201_vm2, %v3288_v13 }
0x150e   :  { %4376 = vmatprep.mubr.msk.f32.mxu0 %vm4555_vm1, %v4554_v43 }
0x151d   :  { %3048 = vrot.lane.b32.xlu0 %v4939_v61, %s4566_s13 }
0x1521   :  { %3367 = vrot.lane.b32.xlu0 %v4935_v60, %s4567_s14 }
0x1525   :  { %3365 = vrot.lane.b32.xlu0 %v4931_v58, %s4568_s15 }
0x1590   :  { %v3040_v25 = vpop.xlane.xlu0 %3039 }
0x1591   :  { %4516 = vrcp.f32 %v3040_v25 }
0x1594   :  { %v3049_v14 = vpop.permute.xlu0 %3048 }
0x1595   :  { %4350 = vmatpush3.msra.mxu1 %v3049_v14 }
0x1596   :  { %4359 = vmatprep.subr.mxu1 %v3202_v63 }
0x1598   :  { %v3368_v1 = vpop.permute.xlu0 %3367 }
0x159e   :  { %v4517_v26 = vpop.eup %4516 }
0x159f   :  { %v3046_v10 = vmul.f32 %v4517_v26, %v4513_v44 }
0x15a1   :  { %4352 = vmatmul.mubr.msk.f32.vlgmr.msra.gmra.mxu1 %vm201_vm2, %v3046_v10 }
0x15a2   :  { %4360 = vmatpush3.msra.mxu1 %v3202_v63 }
0x15a3   :  { %4369 = vmatprep.subr.mxu1 %v4554_v43 }
0x15c9   :  { %v3196_v11 = vpop.f32.mrf.mxu0 }
0x15cb   :  { %v4358_v15 = vpop.f32.mrf.mxu0 }
0x15cc   :  { %v3761_v15 = vld [vmem:[%s5209_s2 + $0x58] sm:$0xff] }
0x15cd   :  { %v3361_v17 = vpop.f32.mrf.mxu0 }
0x15ce   :  { %v3443_v19 = vmul.f32 0.17677669, %v3361_v17  ;;  %v3760_v17 = vld [vmem:[%s5209_s2 + $0x40] sm:$0xff] }
0x15cf   :  { %v4368_v20 = vpop.f32.mrf.mxu0 }
0x15d0   :  { %v3445_v21 = vadd.f32 %v3443_v19, %v4698_v62  ;;  %v3366_v62 = vpop.permute.xlu0 %3365  ;;  %v3759_v19 = vld [vmem:[%s5209_s2 + $0x28] sm:$0xff]  ;;  %v3758_v20 = vld [vmem:[%s5209_s2 + $0x10] sm:$0xff] }
0x15d2   :  { %v3447_v58 = vsel %vm201_vm2, %v3445_v21, -inf }
0x15d3   :  { %3448 = vmax.xlane.f32.xlu1 %v3447_v58  ;;  %v3863_v58 = vld [vmem:[%s5210_s3 + $0x70] sm:$0xff] }
0x15e4   :  { %3469 = vrot.lane.b32.xlu1 %v4939_v61, %s4569_s16 }
0x15e8   :  { %3622 = vrot.lane.b32.xlu1 %v4887_v23, %s4563_s10 }
0x165c   :  { %v3449_v22 = vpop.xlane.xlu1 %3448 }
0x165d   :  { %v3453_v23 = vsub.f32 %v3445_v21, %v3449_v22  ;;  %v3864_v21 = vld [vmem:[%s5210_s3 + $0x78] sm:$0xff]  ;;  %v3862_v22 = vld [vmem:[%s5210_s3 + $0x68] sm:$0xff] }
0x165f   :  { %v3455_v61 = vmul.f32 1.442695, %v3453_v23  ;;  %v3856_v23 = vld [vmem:[%s5210_s3 + $0x38] sm:$0xff] }
0x1660   :  { %v3470_v0 = vpop.permute.xlu1 %3469 }
0x1661   :  { %4375 = vmatpush3.msra.mxu0 %v3470_v0  ;;  %v3120_v31 = vpop.f32.mrf.mxu1  ;;  %4518 = vpow2.f32 %v3455_v61  ;;  %v3860_v0 = vld [vmem:[%s5210_s3 + $0x58] sm:$0xff]  ;;  %v3855_v61 = vld [vmem:[%s5210_s3 + $0x30] sm:$0xff] }
0x1662   :  { %4361 = vmatprep.mubr.msk.f32.mxu1 %vm201_vm2, %v3120_v31  ;;  %v3859_v31 = vld [vmem:[%s5210_s3 + $0x50] sm:$0xff] }
0x1663   :  { %v4353_v32 = vpop.f32.mrf.mxu1  ;;  %4362 = vmatmul.mubr.msk.f32.vlgmr.msra.gmra.mxu1 %vm201_vm2, %v3196_v11 }
0x1664   :  { %4370 = vmatpush3.xpose.msk.msra.mxu1 %vm201_vm2, %v3368_v1  ;;  %4371 = vmatprep.mubr.msk.f32.mxu1 %vm4555_vm1, %v4554_v43  ;;  %v3861_v1 = vld [vmem:[%s5210_s3 + $0x60] sm:$0xff]  ;;  %v3858_v32 = vld [vmem:[%s5210_s3 + $0x48] sm:$0xff] }
0x1665   :  { %4379 = vmatprep.subr.mxu1 %v4554_v43 }
0x1667   :  { %4372 = vmatmul.mubr.msk.f32.vlgmr.msra.gmra.mxu1 %vm201_vm2, %v3366_v62  ;;  %v3857_v62 = vld [vmem:[%s5210_s3 + $0x40] sm:$0xff] }
0x1668   :  { %4381 = vmatprep.mubr.msk.f32.mxu1 %vm4555_vm1, %v4554_v43 }
0x166e   :  { %v4519_v47 = vpop.eup %4518 }
0x166f   :  { %v3459_v48 = vsel %vm201_vm2, %v4519_v47, 0.0 }
0x1723   :  { %v4363_v34 = vpop.f32.mrf.mxu1 }
0x1724   :  { %v3286_v8 = vadd.f32 %v4363_v34, %v2863_v33  ;;  %v3854_v33 = vld [vmem:[%s5210_s3 + $0x28] sm:$0xff]  ;;  %v3853_v34 = vld [vmem:[%s5210_s3 + $0x20] sm:$0xff] }
0x1725   :  { %v3276_v3 = vpop.f32.mrf.mxu1 }
0x1726   :  { %v3285_v35 = vadd.f32 %v3276_v3, %v2858_v45 }
0x1727   :  { %v3439_v40 = vpop.f32.mrf.mxu1 }
0x1728   :  { %v3444_v41 = vmul.f32 0.17677669, %v3439_v40 }
0x1729   :  { %v4373_v42 = vpop.f32.mrf.mxu1 }
0x172a   :  { %v3446_v46 = vadd.f32 %v3444_v41, %v4701_v2  ;;  %v3623_v2 = vpop.permute.xlu1 %3622 }
0x172b   :  { %4384 = vmatprep.subr.mxu0 %v3623_v2 }
0x172c   :  { %v3450_v43 = vsel %vm201_vm2, %v3446_v46, -inf }
0x172d   :  { %3451 = vmax.xlane.f32.xlu0 %v3450_v43 }
0x1731   :  { %3460 = vadd.xlane.f32.xlu0 %v3459_v48 }
0x17b6   :  { %v3452_v36 = vpop.xlane.xlu0 %3451 }
0x17b7   :  { %v3454_v49 = vsub.f32 %v3446_v46, %v3452_v36 }
0x17b9   :  { %v3457_v50 = vmul.f32 1.442695, %v3454_v49 }
0x17ba   :  { %v3461_v51 = vpop.xlane.xlu0 %3460 }
0x17bb   :  { %4520 = vpow2.f32 %v3457_v50 }
0x17bc   :  { %4522 = vrcp.f32 %v3461_v51  ;;  %v3748_v51 = vsub.s32 4, %v4646_v27 }
0x17c8   :  { %v4521_v37 = vpop.eup %4520 }
0x17c9   :  { %v4523_v9 = vpop.eup %4522  ;;  %v3462_v38 = vsel %vm201_vm2, %v4521_v37, 0.0 }
0x17ca   :  { %3463 = vadd.xlane.f32.xlu0 %v3462_v38  ;;  %v3467_v52 = vmul.f32 %v4523_v9, %v4519_v47  ;;  %v3749_v38 = vrot.slane %v5107_v12, %v3748_v51 }
0x17cc   :  { %4377 = vmatmul.mubr.msk.f32.vlgmr.msra.gmra.mxu0 %vm201_vm2, %v3467_v52 }
0x17cd   :  { %4385 = vmatpush3.msra.mxu0 %v3623_v2 }
0x17ce   :  { %4400 = vmatprep.subr.mxu0 %v3864_v21 }
0x17e0   :  { %3545 = vrot.lane.b32.xlu0 %v4935_v60, %s4569_s16  ;;  %v3710_v60 = vsub.s32 7, %v4646_v27 }
0x17e2   :  { %v3711_v29 = vrot.slane %v5107_v12, %v3710_v60  ;;  %v3852_v60 = vld [vmem:[%s5210_s3 + $0x18] sm:$0xff] }
0x1853   :  { %v3464_v24 = vpop.xlane.xlu0 %3463 }
0x1854   :  { %4524 = vrcp.f32 %v3464_v24 }
0x1857   :  { %v3546_v54 = vpop.permute.xlu0 %3545 }
0x1858   :  { %4380 = vmatpush3.msra.mxu1 %v3546_v54 }
0x1859   :  { %4389 = vmatprep.subr.mxu1 %v3761_v15 }
0x1861   :  { %v4525_v55 = vpop.eup %4524 }
0x1862   :  { %v3468_v39 = vmul.f32 %v4525_v55, %v4521_v37  ;;  %v3754_v37 = vsub.s32 5, %v4646_v27 }
0x1864   :  { %4382 = vmatmul.mubr.msk.f32.vlgmr.msra.gmra.mxu1 %vm201_vm2, %v3468_v39  ;;  %v3755_v54 = vrot.slane %v5107_v12, %v3754_v37  ;;  %v3851_v12 = vld [vmem:[%s5210_s3 + $0x10] sm:$0xff] }
0x1865   :  { %4390 = vmatpush3.msra.mxu1 %v3761_v15 }
0x1866   :  { %4391 = vmatprep.subr.mxu1 %v3760_v17 }
0x1867   :  { %4392 = vmatpush3.msra.mxu1 %v3760_v17 }
0x1868   :  { %4393 = vmatprep.subr.mxu1 %v3759_v19 }
0x1869   :  { %4394 = vmatpush3.msra.mxu1 %v3759_v19 }
0x186a   :  { %4395 = vmatprep.subr.mxu1 %v3758_v20 }
0x186b   :  { %4396 = vmatpush3.msra.mxu1 %v3758_v20 }
0x188c   :  { %v3541_v59 = vpop.f32.mrf.mxu0 }
0x188d   :  { %4386 = vmatprep.mubr.msk.f32.mxu0 %vm201_vm2, %v3541_v59 }
0x188e   :  { %v4378_v53 = vpop.f32.mrf.mxu0 }
0x1924   :  { %v3617_v56 = vpop.f32.mrf.mxu1 }
0x1925   :  { %4387 = vmatmul.mubr.msk.f32.vlgmr.msra.gmra.mxu0 %vm201_vm2, %v3617_v56 }
0x1926   :  { %v4383_v57 = vpop.f32.mrf.mxu1  ;;  %4401 = vmatpush3.msra.mxu0 %v3864_v21 }
0x1927   :  { %4402 = vmatprep.subr.mxu0 %v3863_v58 }
0x1928   :  { %4403 = vmatpush3.msra.mxu0 %v3863_v58 }
0x1929   :  { %4404 = vmatprep.subr.mxu0 %v3862_v22 }
0x192a   :  { %4405 = vmatpush3.msra.mxu0 %v3862_v22 }
0x192b   :  { %4406 = vmatprep.subr.mxu0 %v3861_v1 }
0x192c   :  { %4407 = vmatpush3.msra.mxu0 %v3861_v1 }
0x192d   :  { %4408 = vmatprep.subr.mxu0 %v3860_v0 }
0x192e   :  { %4409 = vmatpush3.msra.mxu0 %v3860_v0 }
0x192f   :  { %4410 = vmatprep.subr.mxu0 %v3859_v31 }
0x1930   :  { %4411 = vmatpush3.msra.mxu0 %v3859_v31 }
0x1931   :  { %4412 = vmatprep.subr.mxu0 %v3858_v32 }
0x1932   :  { %4413 = vmatpush3.msra.mxu0 %v3858_v32 }
0x1933   :  { %4414 = vmatprep.subr.mxu0 %v3857_v62 }
0x1934   :  { %4415 = vmatpush3.msra.mxu0 %v3857_v62 }
0x1935   :  { %4416 = vmatprep.subr.mxu0 %v3856_v23 }
0x1936   :  { %4417 = vmatpush3.msra.mxu0 %v3856_v23 }
0x1937   :  { %4418 = vmatprep.subr.mxu0 %v3855_v61 }
0x1938   :  { %4419 = vmatpush3.msra.mxu0 %v3855_v61 }
0x1939   :  { %4420 = vmatprep.subr.mxu0 %v3854_v33 }
0x193a   :  { %4421 = vmatpush3.msra.mxu0 %v3854_v33 }
0x193b   :  { %4422 = vmatprep.subr.mxu0 %v3853_v34 }
0x193c   :  { %4423 = vmatpush3.msra.mxu0 %v3853_v34 }
0x193d   :  { %4424 = vmatprep.subr.mxu0 %v3852_v60 }
0x193e   :  { %4425 = vmatpush3.msra.mxu0 %v3852_v60 }
0x193f   :  { %4426 = vmatprep.subr.mxu0 %v3851_v12 }
0x1940   :  { %4427 = vmatpush3.msra.mxu0 %v3851_v12 }
0x19e5   :  { %v4388_v63 = vpop.f32.mrf.mxu0 }
0x19e6   :  { %v3707_v44 = vadd.f32 %v4388_v63, %v3286_v8  ;;  %v3849_v63 = vld [vmem:[%s5210_s3] sm:$0xff] }
0x19e7   :  { %v3697_v4 = vpop.f32.mrf.mxu0 }
0x19e8   :  { %v3713_v5 = vadd.f32 %v3711_v29, %v3707_v44  ;;  %v3706_v6 = vadd.f32 %v3697_v4, %v3285_v35  ;;  %v4531_v44 = vld [vmem:[%s5208_s1 + $0x8] sm:$0xf] }
0x19e9   :  { %v3765_v4 = vrot.slane %v4531_v44, %v109_v30 }
0x19ea   :  { %v5111_v7 = vadd.f32 %v3713_v5, %v4869_v16  ;;  %v3712_v13 = vadd.f32 %v3711_v29, %v3706_v6  ;;  %v3850_v29 = vld [vmem:[%s5210_s3 + $0x8] sm:$0xff]  ;;  %s4570_s3 = smov [#allocation2]  }
0x19eb   :  { %4428 = vmatprep.subr.mxu0 %v3850_v29  ;;  %s3955_s2 = sshll.u32 %s4570_s3, 4  ;;  %s3956_s2 = int_to_ptr.vmem [resolvable:$true] %s3955_s2 }
0x19ec   :  { %v5114_v25 = vadd.f32 %v3712_v13, %v4872_v18  ;;  %v3719_v14 = vsel %vm69_vm0, %v5111_v7, 0.0  ;;  %v3725_v11 = vmul.f32 %v5111_v7, %v5111_v7  ;;  %4429 = vmatpush3.msra.mxu0 %v3850_v29  ;;  %s4532_s1 = scalar_lea.vmem %s3956_s2, 256  ;;  %p4537_p1 = scmp.lt.s32.totalorder %s3956_s2, %s3956_s2 }
0x19ed   :  { %3720 = vadd.xlane.f32.xlu0 %v3719_v14  ;;  %4430 = vmatprep.subr.mxu0 %v3849_v63  ;;  %p4533_p0 = scmp.ne.s32.totalorder %s3956_s2, %s4532_s1  ;;  %p4538_p2 = scmp.lt.s32.totalorder %s4532_s1, %s4532_s1 }
0x19ee   :  { %v3716_v26 = vsel %vm69_vm0, %v5114_v25, 0.0  ;;  %v3724_v10 = vmul.f32 %v5114_v25, %v5114_v25  ;;  %v3729_v18 = vsel %vm69_vm0, %v3725_v11, 0.0  ;;  %4431 = vmatpush3.msra.mxu0 %v3849_v63  ;;  %v3945_v11 = vrot.slane %v4531_v44, %v4649_v28 }
0x19ef   :  { %3717 = vadd.xlane.f32.xlu1 %v3716_v26  ;;  %p4539_p3 = por %p4538_p2, %p4537_p1 }
0x19f0   :  { %v3726_v16 = vsel %vm69_vm0, %v3724_v10, 0.0 }
0x19f1   :  { %3727 = vadd.xlane.f32.xlu0 %v3726_v16  ;;  %p4540_p4 = pnand %p4539_p3, %p4533_p0 }
0x19f3   :  { %3730 = vadd.xlane.f32.xlu1 %v3729_v18 }
0x1a76   :  { %v3721_v45 = vpop.xlane.xlu0 %3720 }
0x1a77   :  { %v3723_v3 = vmul.f32 0.03125, %v3721_v45 }
0x1a78   :  { %v3718_v8 = vpop.xlane.xlu1 %3717 }
0x1a79   :  { %v3722_v35 = vmul.f32 0.03125, %v3718_v8  ;;  %v3735_v43 = vmul.f32 %v3723_v3, %v3723_v3  ;;  %v3739_v2 = vsub.f32 %v5111_v7, %v3723_v3 }
0x1a7a   :  { %v3728_v40 = vpop.xlane.xlu0 %3727 }
0x1a7b   :  { %v3734_v41 = vmul.f32 %v3722_v35, %v3722_v35  ;;  %v3732_v42 = vmul.f32 0.03125, %v3728_v40  ;;  %v3738_v9 = vsub.f32 %v5114_v25, %v3722_v35 }
0x1a7c   :  { %v3731_v46 = vpop.xlane.xlu1 %3730 }
0x1a7d   :  { %v3736_v47 = vsub.f32 %v3732_v42, %v3734_v41  ;;  %v3733_v48 = vmul.f32 0.03125, %v3731_v46 }
0x1a7f   :  { %v3740_v36 = vadd.f32 1e-05, %v3736_v47  ;;  %v3737_v49 = vsub.f32 %v3733_v48, %v3735_v43 }
0x1a81   :  { %4526 = vrsqrt.f32 %v3740_v36  ;;  %v3741_v50 = vadd.f32 1e-05, %v3737_v49 }
0x1a83   :  { %4528 = vrsqrt.f32 %v3741_v50 }
0x1a8e   :  { %v4527_v52 = vpop.eup %4526 }
0x1a8f   :  { %v3744_v24 = vmul.f32 %v4527_v52, %v3738_v9 }
0x1a90   :  { %v4529_v55 = vpop.eup %4528 }
0x1a91   :  { %v3745_v39 = vmul.f32 %v4529_v55, %v3739_v2  ;;  %v3750_v59 = vmul.f32 %v3749_v38, %v3744_v24 }
0x1a93   :  { %v3751_v53 = vmul.f32 %v3749_v38, %v3745_v39  ;;  %v3756_v56 = vadd.f32 %v3755_v54, %v3750_v59 }
0x1a95   :  { %v3757_v57 = vadd.f32 %v3755_v54, %v3751_v53  ;;  %4397 = vmatprep.mubr.msk.f32.mxu1 %vm69_vm0, %v3756_v56 }
0x1a97   :  { %4398 = vmatmul.mubr.msk.f32.vlgmr.msra.gmra.mxu1 %vm69_vm0, %v3757_v57 }
0x1b57   :  { %v4399_v5 = vpop.f32.mrf.mxu1 }
0x1b58   :  { %v3844_v6 = vadd.f32 %v4399_v5, %v3765_v4 }
0x1b59   :  { %v3838_v13 = vpop.f32.mrf.mxu1 }
0x1b5a   :  { %v3839_v14 = vadd.f32 %v3838_v13, %v3765_v4  ;;  %v3848_v10 = vmax.f32 %v3844_v6, 0.0 }
0x1b5c   :  { %v3847_v26 = vmax.f32 %v3839_v14, 0.0 }
0x1b5e   :  { %4432 = vmatprep.mubr.f32.mxu0 %v3847_v26 }
0x1b5f   :  { %4433 = vmatmul.mubr.f32.vlgmr.msra.gmra.mxu0 %v3848_v10 }
0x1c1f   :  { %v4434_v16 = vpop.f32.mrf.mxu0 }
0x1c20   :  { %v3941_v18 = vadd.f32 %v4434_v16, %v5111_v7 }
0x1c21   :  { %v3931_v15 = vpop.f32.mrf.mxu0 }
0x1c22   :  { %v3947_v17 = vadd.f32 %v3945_v11, %v3941_v18  ;;  %v3940_v27 = vadd.f32 %v3931_v15, %v5114_v25 }
0x1c24   :  { %3949 = vst.msk [vmem:[#allocation2 + $0x8] sm:$0xff] %vm69_vm0, %v3947_v17  ;;  %v3946_v30 = vadd.f32 %v3945_v11, %v3940_v27 }
0x1c26   :  { %3948 = vst.msk [vmem:[#allocation2] sm:$0xff] %vm69_vm0, %v3946_v30 }
0x1c27   :  { %4543 = shalt.err (!%p4540_p4)
}
0x1c28   :  { %s4571_s18 = smov 128   ;;  %s4572_s19 = smov 8  }
0x1c29   :  { %3961 = dma.vmem_to_hbm [thread:$0]  %s3956_s2, 256, %s5211_s4, [#allocation3], %s4571_s18, %s4571_s18, %s4572_s19  }
0x1c2a   :  { %4552 = dma.done.wait [#allocation3], 256  }
0x1c2b   :  { %4553 = vsyncadd [#allocation3], 4294967040 }
0x1c2c   :  { %3965 = vsyncpa [#allocation3], 1 }

</bundles_post_ra>
